<compile_context>
chip_gen: v5e
topology: v5e:2x2
jax: 0.10.0
libtpu: 0.0.40
codegen_flags: <defaults>
</compile_context>

<pallas_src>
import math
import numpy as np
import jax
import jax.numpy as jnp
from jax.experimental import pallas as pl
from jax.experimental.pallas import tpu as pltpu

DIM = 32     # encoder output dim (fc1 out features)
K = 4        # mixture components per ProgramStep
STEPS = 3    # number of program steps
BATCH = 2
S2 = 16      # 4x4 spatial positions after conv2 + pool

_VMEM = pl.BlockSpec(memory_space=pltpu.MemorySpace.VMEM)


# ----------------------------- Pallas kernels -----------------------------

def _conv1_kernel(p_ref, w_ref, b_ref, o_ref):
    # p_ref: (4*N, 25) im2col patches, the 4 maxpool offsets stacked along rows
    # o_ref: (N, 10) = relu(maxpool2(conv1(x)))
    n = o_ref.shape[0]
    m = jnp.dot(p_ref[...], w_ref[...], preferred_element_type=jnp.float32)
    h = jnp.maximum(jnp.maximum(m[0:n], m[n:2 * n]),
                    jnp.maximum(m[2 * n:3 * n], m[3 * n:4 * n]))
    o_ref[...] = jnp.maximum(h + b_ref[...], 0.0)


def _fused_kernel(p2_ref, w2_ref, b2_ref,                       # conv2
                  wwide_ref, maskfc_ref, sumcols_ref, sumrows_ref, bfc_ref,  # fc1
                  a1_ref, a2_ref, c2_ref,                        # CF_prior (matmul form)
                  wl_ref, bl_ref, expand_ref, sumblk_ref,        # CF_likelihood / combine
                  wdec_ref, bdec_ref,                            # decoder
                  enc_ref, out_ref):
    # ---- conv2 + maxpool2 + relu (dropout2d = identity, eval semantics) ----
    n = p2_ref.shape[0] // 4                                     # B*16 rows
    m = jnp.dot(p2_ref[...], w2_ref[...], preferred_element_type=jnp.float32)
    h2 = jnp.maximum(jnp.maximum(m[0:n], m[n:2 * n]),
                     jnp.maximum(m[2 * n:3 * n], m[3 * n:4 * n]))
    h2 = jnp.maximum(h2 + b2_ref[...], 0.0)                      # (B*16, 20)

    # ---- fc1 + relu, flatten-free: rows stay (b, spatial), lanes = channel.
    # h[b,o] = sum_{s,c} h2[(b,s),c] * wfc[c*16+s, o]  via constant matrices.
    u = jnp.dot(h2, wwide_ref[...], preferred_element_type=jnp.float32)      # (B*16, 16*dim)
    v = jnp.dot(u * maskfc_ref[...], sumcols_ref[...],
                preferred_element_type=jnp.float32)                          # (B*16, dim)
    h = jnp.dot(sumrows_ref[...], v, preferred_element_type=jnp.float32)     # (B, dim)
    h = jnp.maximum(h + bfc_ref[...], 0.0)
    # TODO(synk): F.dropout / nn.Dropout2d treated as identity (eval mode);
    # training-mode stochastic dropout is not reproduced.
    enc_ref[...] = h                                             # InputEncoder output

    # ---- 3 x ProgramStep (params VMEM-resident across all steps) ----
    a1 = a1_ref[...]; a2 = a2_ref[...]; c2 = c2_ref[...]
    wl = wl_ref[...]; bl = bl_ref[...]
    expand = expand_ref[...]; sumblk = sumblk_ref[...]
    for _ in range(STEPS):
        # diagonal-Gaussian log-pdfs as two tiny matmuls (no XLU reductions)
        lp = (jnp.dot(h * h, a1, preferred_element_type=jnp.float32)
              + jnp.dot(h, a2, preferred_element_type=jnp.float32) + c2)     # (B, k)
        mmax = jnp.max(lp, axis=1, keepdims=True)
        ps = jnp.exp(lp - mmax)                                              # (B, k)
        z = jnp.sum(ps, axis=1, keepdims=True)                               # (B, 1)
        # all k sigmoid-linear likelihoods in one lane-dense matmul
        lik = jax.nn.sigmoid(
            jnp.dot(h, wl, preferred_element_type=jnp.float32) + bl)         # (B, k*dim)
        # mixture combine without lane slices: Expand/SumBlk constant matmuls
        wfull = jnp.dot(ps, expand, preferred_element_type=jnp.float32)      # (B, k*dim)
        num = jnp.dot(wfull * lik, sumblk, preferred_element_type=jnp.float32)
        h = num / z                                              # exact normalization

    # ---- decoder + log_softmax ----
    logits = jnp.dot(h, wdec_ref[...],
                     preferred_element_type=jnp.float32) + bdec_ref[...]
    mx = jnp.max(logits, axis=1, keepdims=True)
    s = logits - mx
    out_ref[...] = s - jnp.log(jnp.sum(jnp.exp(s), axis=1, keepdims=True))


# ----------------------------- wrapper glue -----------------------------

def _patches(x_nhwc):
    # one HLO per conv layer instead of ~100 slices/stacks
    return jax.lax.conv_general_dilated_patches(
        x_nhwc, filter_shape=(5, 5), window_strides=(1, 1), padding='VALID',
        dimension_numbers=('NHWC', 'HWIO', 'NHWC'))


def _pool_stack(patches, pool=2):
    """(B, H, W, F) conv patches -> (pool*pool*B*Hp*Wp, F) with the maxpool
    offsets stacked along the leading row blocks; rows within a block are
    ordered (b, yo, xo)."""
    B, H, W, F = patches.shape
    Hp, Wp = H // pool, W // pool
    p = patches.reshape(B, Hp, pool, Wp, pool, F)
    p = jnp.transpose(p, (2, 4, 0, 1, 3, 5))
    return p.reshape(pool * pool * B * Hp * Wp, F), (Hp, Wp)


def init_params(key, dim=DIM, k=K):
    """Random parameters. Conv weights are stored directly in im2col/matmul
    layout, rows following the feature order of conv_general_dilated_patches
    (a torch Conv2d weight (O,I,kh,kw) would map via transpose to (I,kh,kw,O)
    then reshape). wfc rows follow torch's NCHW view(-1,320) order."""
    ks = jax.random.split(key, 10)
    w1 = jax.random.normal(ks[0], (25, 10), jnp.float32) / 5.0
    b1 = jax.random.normal(ks[1], (1, 10), jnp.float32) * 0.05
    w2 = jax.random.normal(ks[2], (250, 20), jnp.float32) / math.sqrt(250.0)
    b2 = jax.random.normal(ks[3], (1, 20), jnp.float32) * 0.05
    wfc = jax.random.normal(ks[4], (320, dim), jnp.float32) / math.sqrt(320.0)
    bfc = jax.random.normal(ks[5], (1, dim), jnp.float32) * 0.05
    mu = jax.random.normal(ks[6], (k, dim), jnp.float32) / math.sqrt(dim / 2.0)
    logsigma = jnp.full((k, dim), 0.1, jnp.float32)
    wl = jax.random.normal(ks[7], (k, dim, dim), jnp.float32) / math.sqrt(dim)
    bl = jax.random.normal(ks[8], (k, dim), jnp.float32) * 0.05
    wdec = jax.random.normal(ks[9], (dim, 10), jnp.float32) / math.sqrt(dim)
    bdec = jnp.zeros((1, 10), jnp.float32)
    return dict(w1=w1, b1=b1, w2=w2, b2=b2, wfc=wfc, bfc=bfc, mu=mu,
                logsigma=logsigma, wl=wl, bl=bl, wdec=wdec, bdec=bdec)


def prepare(params, batch, dim=DIM, k=K):
    """One-time (outside-jit) precompute of every data-independent constant
    the fused kernel needs; nothing here is re-evaluated per forward call."""
    out = {}
    out['w1'] = params['w1']
    out['b1'] = params['b1']
    # pad conv2 contraction depth 250 -> 256 (v5e 128-deep MXU alignment)
    out['w2'] = jnp.pad(params['w2'], ((0, 6), (0, 0)))
    out['b2'] = params['b2']

    # fc1 junction constants (kill the NCHW transpose + in-kernel flatten):
    #   Wwide[c, s*dim+o] = wfc[c*16+s, o]
    out['wwide'] = params['wfc'].reshape(20, S2, dim).reshape(20, S2 * dim)
    idx = jnp.arange(S2 * dim)
    mask_one = (idx[None, :] // dim == jnp.arange(S2)[:, None]).astype(jnp.float32)
    out['maskfc'] = jnp.tile(mask_one, (batch, 1))                     # (B*16, 16*dim)
    out['sumcols'] = (idx[:, None] % dim ==
                      jnp.arange(dim)[None, :]).astype(jnp.float32)    # (16*dim, dim)
    out['sumrows'] = (jnp.arange(batch)[:, None] ==
                      (jnp.arange(batch * S2)[None, :] // S2)).astype(jnp.float32)
    out['bfc'] = params['bfc']

    # CF_prior in matmul form: lp = (h*h)@A1 + h@A2 + c2
    isig = jnp.exp(-2.0 * params['logsigma'])                          # (k, dim)
    out['a1'] = (-0.5 * isig).T                                        # (dim, k)
    out['a2'] = (params['mu'] * isig).T                                # (dim, k)
    const = -0.5 * jnp.sum(math.log(2.0 * math.pi)
                           + 2.0 * params['logsigma'], axis=1)         # (k,)
    out['c2'] = (const - 0.5 * jnp.sum(params['mu'] ** 2 * isig,
                                       axis=1)).reshape(1, k)

    # CF_likelihood: one lane-dense matmul; combine via constant matrices
    out['wl_cat'] = jnp.transpose(params['wl'], (1, 0, 2)).reshape(dim, k * dim)
    out['bl_cat'] = params['bl'].reshape(1, k * dim)
    jdx = jnp.arange(k * dim)
    out['expand'] = (jdx[None, :] // dim ==
                     jnp.arange(k)[:, None]).astype(jnp.float32)       # (k, k*dim)
    out['sumblk'] = (jdx[:, None] % dim ==
                     jnp.arange(dim)[None, :]).astype(jnp.float32)     # (k*dim, dim)

    out['wdec'] = params['wdec']
    out['bdec'] = params['bdec']
    return out


@jax.jit
def forward(x, prep):
    """x: (B, 1, 28, 28) NCHW.  Returns (encoder_out (B, DIM), log_probs (B, 10))."""
    B = x.shape[0]
    x_nhwc = jnp.transpose(x, (0, 2, 3, 1))                            # (B, 28, 28, 1)

    # ---- call 1: conv1 + maxpool2 + relu ----
    p1, (H1, W1) = _pool_stack(_patches(x_nhwc))                       # (4*B*144, 25)
    n1 = B * H1 * W1
    h1 = pl.pallas_call(
        _conv1_kernel,
        out_shape=jax.ShapeDtypeStruct((n1, 10), jnp.float32),
        in_specs=[_VMEM, _VMEM, _VMEM],
        out_specs=_VMEM,
    )(p1, prep['w1'], prep['b1'])

    # ---- call 2: conv2+pool+relu + fc1+relu + 3x ProgramStep + decoder ----
    p2, (H2, W2) = _pool_stack(_patches(h1.reshape(B, H1, W1, 10)))    # (4*B*16, 250)
    p2 = jnp.pad(p2, ((0, 0), (0, prep['w2'].shape[0] - p2.shape[1])))  # K 250->256

    enc, logp = pl.pallas_call(
        _fused_kernel,
        out_shape=(jax.ShapeDtypeStruct((B, DIM), jnp.float32),
                   jax.ShapeDtypeStruct((B, 10), jnp.float32)),
        in_specs=[_VMEM] * 17,
        out_specs=(_VMEM, _VMEM),
    )(p2, prep['w2'], prep['b2'],
      prep['wwide'], prep['maskfc'], prep['sumcols'], prep['sumrows'], prep['bfc'],
      prep['a1'], prep['a2'], prep['c2'],
      prep['wl_cat'], prep['bl_cat'], prep['expand'], prep['sumblk'],
      prep['wdec'], prep['bdec'])
    return enc, logp


# ----------------------------- pure-JAX reference -----------------------------

def ref_forward(x, P):
    hd = jax.lax.Precision.HIGHEST
    B = x.shape[0]
    x_nhwc = jnp.transpose(x, (0, 2, 3, 1))
    p1, (H1, W1) = _pool_stack(_patches(x_nhwc))
    m = jnp.dot(p1, P['w1'], precision=hd).reshape(4, B * H1 * W1, 10)
    h1 = jnp.maximum(jnp.max(m, axis=0) + P['b1'], 0.0)
    p2, (H2, W2) = _pool_stack(_patches(h1.reshape(B, H1, W1, 10)))
    m = jnp.dot(p2, P['w2'], precision=hd).reshape(4, B * H2 * W2, 20)
    h2 = jnp.maximum(jnp.max(m, axis=0) + P['b2'], 0.0)                # (B*16, 20)
    # torch x.view(-1, 320): NCHW (channel-major) flatten
    feat = jnp.transpose(h2.reshape(B, H2 * W2, 20), (0, 2, 1)).reshape(B, 320)
    h_enc = jnp.maximum(jnp.dot(feat, P['wfc'], precision=hd) + P['bfc'], 0.0)

    h = h_enc
    sigma2 = jnp.exp(2.0 * P['logsigma'])
    const = -0.5 * jnp.sum(jnp.log(2.0 * math.pi * sigma2), axis=1)    # (k,)
    for _ in range(STEPS):
        diff = h[None, :, :] - P['mu'][:, None, :]                     # (k, B, dim)
        lps = const[:, None] - 0.5 * jnp.sum(diff * diff / sigma2[:, None, :], axis=2)
        lps = lps - jnp.max(lps, axis=0)
        ps = jnp.exp(lps)
        ws = ps / jnp.sum(ps, axis=0)                                  # (k, B)
        lik = jax.nn.sigmoid(
            jnp.einsum('bd,kde->kbe', h, P['wl'], precision=hd) + P['bl'][:, None, :])
        h = jnp.sum(ws[:, :, None] * lik, axis=0)
    logits = jnp.dot(h, P['wdec'], precision=hd) + P['bdec']
    return h_enc, jax.nn.log_softmax(logits, axis=1)


# ----------------------------- main -----------------------------

if __name__ == "__main__":
    key = jax.random.PRNGKey(0)
    kx, kp = jax.random.split(key)
    # (B, 1, 28, 28) is implied by the module: 20*4*4 = 320 after two conv+pool
    x = jax.random.normal(kx, (BATCH, 1, 28, 28), dtype=jnp.float32)
    params = init_params(kp, DIM, K)
    prep = prepare(params, BATCH)          # one-time constant precompute

    enc, out = forward(x, prep)
    enc = jax.block_until_ready(enc)
    out = jax.block_until_ready(out)

    ref_enc, ref_out = ref_forward(x, params)
    np.testing.assert_allclose(np.asarray(enc), np.asarray(ref_enc),
                               rtol=1e-2, atol=1e-2)
    np.testing.assert_allclose(np.asarray(out), np.asarray(ref_out),
                               rtol=1e-2, atol=1e-2)
    assert enc.shape == (BATCH, DIM) and out.shape == (BATCH, 10)
    print("KERNEL_OK")
</pallas_src>

<mosaic_0001>
module attributes {stable_mosaic.version = 11 : i64} {
  func.func @_conv1_kernel(%arg0: memref<1152x25xf32, #tpu.memory_space<vmem>>, %arg1: memref<25x10xf32, #tpu.memory_space<vmem>>, %arg2: memref<1x10xf32, #tpu.memory_space<vmem>>, %arg3: memref<288x10xf32, #tpu.memory_space<vmem>>) attributes {dimension_semantics = [], scalar_prefetch = 0 : i64, scratch_operands = 0 : i64, tpu.core_type = #tpu.core_type<tc>} {
    %c0 = arith.constant 0 : index
    %c0_0 = arith.constant 0 : index
    %0 = vector.load %arg0[%c0, %c0_0] : memref<1152x25xf32, #tpu.memory_space<vmem>>, vector<1152x25xf32>
    %c0_1 = arith.constant 0 : index
    %c0_2 = arith.constant 0 : index
    %1 = vector.load %arg1[%c0_1, %c0_2] : memref<25x10xf32, #tpu.memory_space<vmem>>, vector<25x10xf32>
    %cst = arith.constant dense<0.000000e+00> : vector<1152x10xf32>
    %2 = tpu.matmul %0, %1, %cst {dimension_numbers = #tpu.dot_dimension_numbers<[1], [0], [0], [1], [0, 0, 1, 1], [], []>} : vector<1152x25xf32>, vector<25x10xf32>, vector<1152x10xf32> -> vector<1152x10xf32>
    %3 = vector.extract_strided_slice %2 {offsets = [0, 0], sizes = [288, 10], strides = [1, 1]} : vector<1152x10xf32> to vector<288x10xf32>
    %4 = vector.extract_strided_slice %2 {offsets = [288, 0], sizes = [288, 10], strides = [1, 1]} : vector<1152x10xf32> to vector<288x10xf32>
    %5 = arith.maximumf %3, %4 : vector<288x10xf32>
    %6 = vector.extract_strided_slice %2 {offsets = [576, 0], sizes = [288, 10], strides = [1, 1]} : vector<1152x10xf32> to vector<288x10xf32>
    %7 = vector.extract_strided_slice %2 {offsets = [864, 0], sizes = [288, 10], strides = [1, 1]} : vector<1152x10xf32> to vector<288x10xf32>
    %8 = arith.maximumf %6, %7 : vector<288x10xf32>
    %9 = arith.maximumf %5, %8 : vector<288x10xf32>
    %c0_3 = arith.constant 0 : index
    %c0_4 = arith.constant 0 : index
    %10 = vector.load %arg2[%c0_3, %c0_4] : memref<1x10xf32, #tpu.memory_space<vmem>>, vector<1x10xf32>
    %11 = vector.broadcast %10 : vector<1x10xf32> to vector<288x10xf32>
    %12 = arith.addf %9, %11 : vector<288x10xf32>
    %cst_5 = arith.constant 0.000000e+00 : f32
    %13 = vector.broadcast %cst_5 : f32 to vector<288x10xf32>
    %14 = arith.maximumf %12, %13 : vector<288x10xf32>
    %c0_6 = arith.constant 0 : index
    %c0_7 = arith.constant 0 : index
    %15 = vector.load %arg3[%c0_6, %c0_7] : memref<288x10xf32, #tpu.memory_space<vmem>>, vector<288x10xf32>
    tpu.vector_store %arg3[%c0_6, %c0_7], %14 {strides = array<i32>} : memref<288x10xf32, #tpu.memory_space<vmem>>, vector<288x10xf32>,
    return
  }
}

module attributes {stable_mosaic.version = 11 : i64} {
  func.func @_fused_kernel(%arg0: memref<128x256xf32, #tpu.memory_space<vmem>>, %arg1: memref<256x20xf32, #tpu.memory_space<vmem>>, %arg2: memref<1x20xf32, #tpu.memory_space<vmem>>, %arg3: memref<20x512xf32, #tpu.memory_space<vmem>>, %arg4: memref<32x512xf32, #tpu.memory_space<vmem>>, %arg5: memref<512x32xf32, #tpu.memory_space<vmem>>, %arg6: memref<2x32xf32, #tpu.memory_space<vmem>>, %arg7: memref<1x32xf32, #tpu.memory_space<vmem>>, %arg8: memref<32x4xf32, #tpu.memory_space<vmem>>, %arg9: memref<32x4xf32, #tpu.memory_space<vmem>>, %arg10: memref<1x4xf32, #tpu.memory_space<vmem>>, %arg11: memref<32x128xf32, #tpu.memory_space<vmem>>, %arg12: memref<1x128xf32, #tpu.memory_space<vmem>>, %arg13: memref<4x128xf32, #tpu.memory_space<vmem>>, %arg14: memref<128x32xf32, #tpu.memory_space<vmem>>, %arg15: memref<32x10xf32, #tpu.memory_space<vmem>>, %arg16: memref<1x10xf32, #tpu.memory_space<vmem>>, %arg17: memref<2x32xf32, #tpu.memory_space<vmem>>, %arg18: memref<2x10xf32, #tpu.memory_space<vmem>>) attributes {dimension_semantics = [], scalar_prefetch = 0 : i64, scratch_operands = 0 : i64, tpu.core_type = #tpu.core_type<tc>} {
    %c0 = arith.constant 0 : index
    %c0_0 = arith.constant 0 : index
    %0 = vector.load %arg0[%c0, %c0_0] : memref<128x256xf32, #tpu.memory_space<vmem>>, vector<128x256xf32>
    %c0_1 = arith.constant 0 : index
    %c0_2 = arith.constant 0 : index
    %1 = vector.load %arg1[%c0_1, %c0_2] : memref<256x20xf32, #tpu.memory_space<vmem>>, vector<256x20xf32>
    %cst = arith.constant dense<0.000000e+00> : vector<128x20xf32>
    %2 = tpu.matmul %0, %1, %cst {dimension_numbers = #tpu.dot_dimension_numbers<[1], [0], [0], [1], [0, 0, 1, 1], [], []>} : vector<128x256xf32>, vector<256x20xf32>, vector<128x20xf32> -> vector<128x20xf32>
    %3 = vector.extract_strided_slice %2 {offsets = [0, 0], sizes = [32, 20], strides = [1, 1]} : vector<128x20xf32> to vector<32x20xf32>
    %4 = vector.extract_strided_slice %2 {offsets = [32, 0], sizes = [32, 20], strides = [1, 1]} : vector<128x20xf32> to vector<32x20xf32>
    %5 = arith.maximumf %3, %4 : vector<32x20xf32>
    %6 = vector.extract_strided_slice %2 {offsets = [64, 0], sizes = [32, 20], strides = [1, 1]} : vector<128x20xf32> to vector<32x20xf32>
    %7 = vector.extract_strided_slice %2 {offsets = [96, 0], sizes = [32, 20], strides = [1, 1]} : vector<128x20xf32> to vector<32x20xf32>
    %8 = arith.maximumf %6, %7 : vector<32x20xf32>
    %9 = arith.maximumf %5, %8 : vector<32x20xf32>
    %c0_3 = arith.constant 0 : index
    %c0_4 = arith.constant 0 : index
    %10 = vector.load %arg2[%c0_3, %c0_4] : memref<1x20xf32, #tpu.memory_space<vmem>>, vector<1x20xf32>
    %11 = vector.broadcast %10 : vector<1x20xf32> to vector<32x20xf32>
    %12 = arith.addf %9, %11 : vector<32x20xf32>
    %cst_5 = arith.constant 0.000000e+00 : f32
    %13 = vector.broadcast %cst_5 : f32 to vector<32x20xf32>
    %14 = arith.maximumf %12, %13 : vector<32x20xf32>
    %c0_6 = arith.constant 0 : index
    %c0_7 = arith.constant 0 : index
    %15 = vector.load %arg3[%c0_6, %c0_7] : memref<20x512xf32, #tpu.memory_space<vmem>>, vector<20x512xf32>
    %cst_8 = arith.constant dense<0.000000e+00> : vector<32x512xf32>
    %16 = tpu.matmul %14, %15, %cst_8 {dimension_numbers = #tpu.dot_dimension_numbers<[1], [0], [0], [1], [0, 0, 1, 1], [], []>} : vector<32x20xf32>, vector<20x512xf32>, vector<32x512xf32> -> vector<32x512xf32>
    %c0_9 = arith.constant 0 : index
    %c0_10 = arith.constant 0 : index
    %17 = vector.load %arg4[%c0_9, %c0_10] : memref<32x512xf32, #tpu.memory_space<vmem>>, vector<32x512xf32>
    %18 = arith.mulf %16, %17 : vector<32x512xf32>
    %c0_11 = arith.constant 0 : index
    %c0_12 = arith.constant 0 : index
    %19 = vector.load %arg5[%c0_11, %c0_12] : memref<512x32xf32, #tpu.memory_space<vmem>>, vector<512x32xf32>
    %cst_13 = arith.constant dense<0.000000e+00> : vector<32x32xf32>
    %20 = tpu.matmul %18, %19, %cst_13 {dimension_numbers = #tpu.dot_dimension_numbers<[1], [0], [0], [1], [0, 0, 1, 1], [], []>} : vector<32x512xf32>, vector<512x32xf32>, vector<32x32xf32> -> vector<32x32xf32>
    %c0_14 = arith.constant 0 : index
    %c0_15 = arith.constant 0 : index
    %21 = vector.load %arg6[%c0_14, %c0_15] : memref<2x32xf32, #tpu.memory_space<vmem>>, vector<2x32xf32>
    %cst_16 = arith.constant dense<0.000000e+00> : vector<2x32xf32>
    %22 = tpu.matmul %21, %20, %cst_16 {dimension_numbers = #tpu.dot_dimension_numbers<[1], [0], [0], [1], [0, 0, 1, 1], [], []>} : vector<2x32xf32>, vector<32x32xf32>, vector<2x32xf32> -> vector<2x32xf32>
    %c0_17 = arith.constant 0 : index
    %c0_18 = arith.constant 0 : index
    %23 = vector.load %arg7[%c0_17, %c0_18] : memref<1x32xf32, #tpu.memory_space<vmem>>, vector<1x32xf32>
    %24 = vector.broadcast %23 : vector<1x32xf32> to vector<2x32xf32>
    %25 = arith.addf %22, %24 : vector<2x32xf32>
    %cst_19 = arith.constant 0.000000e+00 : f32
    %26 = vector.broadcast %cst_19 : f32 to vector<2x32xf32>
    %27 = arith.maximumf %25, %26 : vector<2x32xf32>
    %c0_20 = arith.constant 0 : index
    %c0_21 = arith.constant 0 : index
    %28 = vector.load %arg17[%c0_20, %c0_21] : memref<2x32xf32, #tpu.memory_space<vmem>>, vector<2x32xf32>
    tpu.vector_store %arg17[%c0_20, %c0_21], %27 {strides = array<i32>} : memref<2x32xf32, #tpu.memory_space<vmem>>, vector<2x32xf32>,
    %c0_22 = arith.constant 0 : index
    %c0_23 = arith.constant 0 : index
    %29 = vector.load %arg8[%c0_22, %c0_23] : memref<32x4xf32, #tpu.memory_space<vmem>>, vector<32x4xf32>
    %c0_24 = arith.constant 0 : index
    %c0_25 = arith.constant 0 : index
    %30 = vector.load %arg9[%c0_24, %c0_25] : memref<32x4xf32, #tpu.memory_space<vmem>>, vector<32x4xf32>
    %c0_26 = arith.constant 0 : index
    %c0_27 = arith.constant 0 : index
    %31 = vector.load %arg10[%c0_26, %c0_27] : memref<1x4xf32, #tpu.memory_space<vmem>>, vector<1x4xf32>
    %c0_28 = arith.constant 0 : index
    %c0_29 = arith.constant 0 : index
    %32 = vector.load %arg11[%c0_28, %c0_29] : memref<32x128xf32, #tpu.memory_space<vmem>>, vector<32x128xf32>
    %c0_30 = arith.constant 0 : index
    %c0_31 = arith.constant 0 : index
    %33 = vector.load %arg12[%c0_30, %c0_31] : memref<1x128xf32, #tpu.memory_space<vmem>>, vector<1x128xf32>
    %c0_32 = arith.constant 0 : index
    %c0_33 = arith.constant 0 : index
    %34 = vector.load %arg13[%c0_32, %c0_33] : memref<4x128xf32, #tpu.memory_space<vmem>>, vector<4x128xf32>
    %c0_34 = arith.constant 0 : index
    %c0_35 = arith.constant 0 : index
    %35 = vector.load %arg14[%c0_34, %c0_35] : memref<128x32xf32, #tpu.memory_space<vmem>>, vector<128x32xf32>
    %36 = arith.mulf %27, %27 : vector<2x32xf32>
    %cst_36 = arith.constant dense<0.000000e+00> : vector<2x4xf32>
    %37 = tpu.matmul %36, %29, %cst_36 {dimension_numbers = #tpu.dot_dimension_numbers<[1], [0], [0], [1], [0, 0, 1, 1], [], []>} : vector<2x32xf32>, vector<32x4xf32>, vector<2x4xf32> -> vector<2x4xf32>
    %cst_37 = arith.constant dense<0.000000e+00> : vector<2x4xf32>
    %38 = tpu.matmul %27, %30, %cst_37 {dimension_numbers = #tpu.dot_dimension_numbers<[1], [0], [0], [1], [0, 0, 1, 1], [], []>} : vector<2x32xf32>, vector<32x4xf32>, vector<2x4xf32> -> vector<2x4xf32>
    %39 = arith.addf %37, %38 : vector<2x4xf32>
    %40 = vector.broadcast %31 : vector<1x4xf32> to vector<2x4xf32>
    %41 = arith.addf %39, %40 : vector<2x4xf32>
    %cst_38 = arith.constant dense<0xFF800000> : vector<2xf32>
    %42 = vector.multi_reduction <maximumf>, %41, %cst_38 [1] : vector<2x4xf32> to vector<2xf32>
    %43 = vector.shape_cast %42 : vector<2xf32> to vector<2x1xf32>
    %44 = vector.broadcast %43 : vector<2x1xf32> to vector<2x4xf32>
    %45 = arith.subf %41, %44 : vector<2x4xf32>
    %46 = math.exp %45 : vector<2x4xf32>
    %cst_39 = arith.constant dense<0.000000e+00> : vector<2xf32>
    %47 = vector.multi_reduction <add>, %46, %cst_39 [1] : vector<2x4xf32> to vector<2xf32>
    %48 = vector.shape_cast %47 : vector<2xf32> to vector<2x1xf32>
    %cst_40 = arith.constant dense<0.000000e+00> : vector<2x128xf32>
    %49 = tpu.matmul %27, %32, %cst_40 {dimension_numbers = #tpu.dot_dimension_numbers<[1], [0], [0], [1], [0, 0, 1, 1], [], []>} : vector<2x32xf32>, vector<32x128xf32>, vector<2x128xf32> -> vector<2x128xf32>
    %50 = vector.broadcast %33 : vector<1x128xf32> to vector<2x128xf32>
    %51 = arith.addf %49, %50 : vector<2x128xf32>
    %52 = arith.negf %51 : vector<2x128xf32>
    %53 = math.exp %52 : vector<2x128xf32>
    %cst_41 = arith.constant 1.000000e+00 : f32
    %54 = vector.broadcast %cst_41 : f32 to vector<2x128xf32>
    %55 = arith.addf %54, %53 : vector<2x128xf32>
    %56 = arith.divf %54, %55 : vector<2x128xf32>
    %cst_42 = arith.constant dense<0.000000e+00> : vector<2x128xf32>
    %57 = tpu.matmul %46, %34, %cst_42 {dimension_numbers = #tpu.dot_dimension_numbers<[1], [0], [0], [1], [0, 0, 1, 1], [], []>} : vector<2x4xf32>, vector<4x128xf32>, vector<2x128xf32> -> vector<2x128xf32>
    %58 = arith.mulf %57, %56 : vector<2x128xf32>
    %cst_43 = arith.constant dense<0.000000e+00> : vector<2x32xf32>
    %59 = tpu.matmul %58, %35, %cst_43 {dimension_numbers = #tpu.dot_dimension_numbers<[1], [0], [0], [1], [0, 0, 1, 1], [], []>} : vector<2x128xf32>, vector<128x32xf32>, vector<2x32xf32> -> vector<2x32xf32>
    %60 = vector.broadcast %48 : vector<2x1xf32> to vector<2x32xf32>
    %61 = arith.divf %59, %60 : vector<2x32xf32>
    %62 = arith.mulf %61, %61 : vector<2x32xf32>
    %cst_44 = arith.constant dense<0.000000e+00> : vector<2x4xf32>
    %63 = tpu.matmul %62, %29, %cst_44 {dimension_numbers = #tpu.dot_dimension_numbers<[1], [0], [0], [1], [0, 0, 1, 1], [], []>} : vector<2x32xf32>, vector<32x4xf32>, vector<2x4xf32> -> vector<2x4xf32>
    %cst_45 = arith.constant dense<0.000000e+00> : vector<2x4xf32>
    %64 = tpu.matmul %61, %30, %cst_45 {dimension_numbers = #tpu.dot_dimension_numbers<[1], [0], [0], [1], [0, 0, 1, 1], [], []>} : vector<2x32xf32>, vector<32x4xf32>, vector<2x4xf32> -> vector<2x4xf32>
    %65 = arith.addf %63, %64 : vector<2x4xf32>
    %66 = vector.broadcast %31 : vector<1x4xf32> to vector<2x4xf32>
    %67 = arith.addf %65, %66 : vector<2x4xf32>
    %cst_46 = arith.constant dense<0xFF800000> : vector<2xf32>
    %68 = vector.multi_reduction <maximumf>, %67, %cst_46 [1] : vector<2x4xf32> to vector<2xf32>
    %69 = vector.shape_cast %68 : vector<2xf32> to vector<2x1xf32>
    %70 = vector.broadcast %69 : vector<2x1xf32> to vector<2x4xf32>
    %71 = arith.subf %67, %70 : vector<2x4xf32>
    %72 = math.exp %71 : vector<2x4xf32>
    %cst_47 = arith.constant dense<0.000000e+00> : vector<2xf32>
    %73 = vector.multi_reduction <add>, %72, %cst_47 [1] : vector<2x4xf32> to vector<2xf32>
    %74 = vector.shape_cast %73 : vector<2xf32> to vector<2x1xf32>
    %cst_48 = arith.constant dense<0.000000e+00> : vector<2x128xf32>
    %75 = tpu.matmul %61, %32, %cst_48 {dimension_numbers = #tpu.dot_dimension_numbers<[1], [0], [0], [1], [0, 0, 1, 1], [], []>} : vector<2x32xf32>, vector<32x128xf32>, vector<2x128xf32> -> vector<2x128xf32>
    %76 = vector.broadcast %33 : vector<1x128xf32> to vector<2x128xf32>
    %77 = arith.addf %75, %76 : vector<2x128xf32>
    %78 = arith.negf %77 : vector<2x128xf32>
    %79 = math.exp %78 : vector<2x128xf32>
    %cst_49 = arith.constant 1.000000e+00 : f32
    %80 = vector.broadcast %cst_49 : f32 to vector<2x128xf32>
    %81 = arith.addf %80, %79 : vector<2x128xf32>
    %82 = arith.divf %80, %81 : vector<2x128xf32>
    %cst_50 = arith.constant dense<0.000000e+00> : vector<2x128xf32>
    %83 = tpu.matmul %72, %34, %cst_50 {dimension_numbers = #tpu.dot_dimension_numbers<[1], [0], [0], [1], [0, 0, 1, 1], [], []>} : vector<2x4xf32>, vector<4x128xf32>, vector<2x128xf32> -> vector<2x128xf32>
    %84 = arith.mulf %83, %82 : vector<2x128xf32>
    %cst_51 = arith.constant dense<0.000000e+00> : vector<2x32xf32>
    %85 = tpu.matmul %84, %35, %cst_51 {dimension_numbers = #tpu.dot_dimension_numbers<[1], [0], [0], [1], [0, 0, 1, 1], [], []>} : vector<2x128xf32>, vector<128x32xf32>, vector<2x32xf32> -> vector<2x32xf32>
    %86 = vector.broadcast %74 : vector<2x1xf32> to vector<2x32xf32>
    %87 = arith.divf %85, %86 : vector<2x32xf32>
    %88 = arith.mulf %87, %87 : vector<2x32xf32>
    %cst_52 = arith.constant dense<0.000000e+00> : vector<2x4xf32>
    %89 = tpu.matmul %88, %29, %cst_52 {dimension_numbers = #tpu.dot_dimension_numbers<[1], [0], [0], [1], [0, 0, 1, 1], [], []>} : vector<2x32xf32>, vector<32x4xf32>, vector<2x4xf32> -> vector<2x4xf32>
    %cst_53 = arith.constant dense<0.000000e+00> : vector<2x4xf32>
    %90 = tpu.matmul %87, %30, %cst_53 {dimension_numbers = #tpu.dot_dimension_numbers<[1], [0], [0], [1], [0, 0, 1, 1], [], []>} : vector<2x32xf32>, vector<32x4xf32>, vector<2x4xf32> -> vector<2x4xf32>
    %91 = arith.addf %89, %90 : vector<2x4xf32>
    %92 = vector.broadcast %31 : vector<1x4xf32> to vector<2x4xf32>
    %93 = arith.addf %91, %92 : vector<2x4xf32>
    %cst_54 = arith.constant dense<0xFF800000> : vector<2xf32>
    %94 = vector.multi_reduction <maximumf>, %93, %cst_54 [1] : vector<2x4xf32> to vector<2xf32>
    %95 = vector.shape_cast %94 : vector<2xf32> to vector<2x1xf32>
    %96 = vector.broadcast %95 : vector<2x1xf32> to vector<2x4xf32>
    %97 = arith.subf %93, %96 : vector<2x4xf32>
    %98 = math.exp %97 : vector<2x4xf32>
    %cst_55 = arith.constant dense<0.000000e+00> : vector<2xf32>
    %99 = vector.multi_reduction <add>, %98, %cst_55 [1] : vector<2x4xf32> to vector<2xf32>
    %100 = vector.shape_cast %99 : vector<2xf32> to vector<2x1xf32>
    %cst_56 = arith.constant dense<0.000000e+00> : vector<2x128xf32>
    %101 = tpu.matmul %87, %32, %cst_56 {dimension_numbers = #tpu.dot_dimension_numbers<[1], [0], [0], [1], [0, 0, 1, 1], [], []>} : vector<2x32xf32>, vector<32x128xf32>, vector<2x128xf32> -> vector<2x128xf32>
    %102 = vector.broadcast %33 : vector<1x128xf32> to vector<2x128xf32>
    %103 = arith.addf %101, %102 : vector<2x128xf32>
    %104 = arith.negf %103 : vector<2x128xf32>
    %105 = math.exp %104 : vector<2x128xf32>
    %cst_57 = arith.constant 1.000000e+00 : f32
    %106 = vector.broadcast %cst_57 : f32 to vector<2x128xf32>
    %107 = arith.addf %106, %105 : vector<2x128xf32>
    %108 = arith.divf %106, %107 : vector<2x128xf32>
    %cst_58 = arith.constant dense<0.000000e+00> : vector<2x128xf32>
    %109 = tpu.matmul %98, %34, %cst_58 {dimension_numbers = #tpu.dot_dimension_numbers<[1], [0], [0], [1], [0, 0, 1, 1], [], []>} : vector<2x4xf32>, vector<4x128xf32>, vector<2x128xf32> -> vector<2x128xf32>
    %110 = arith.mulf %109, %108 : vector<2x128xf32>
    %cst_59 = arith.constant dense<0.000000e+00> : vector<2x32xf32>
    %111 = tpu.matmul %110, %35, %cst_59 {dimension_numbers = #tpu.dot_dimension_numbers<[1], [0], [0], [1], [0, 0, 1, 1], [], []>} : vector<2x128xf32>, vector<128x32xf32>, vector<2x32xf32> -> vector<2x32xf32>
    %112 = vector.broadcast %100 : vector<2x1xf32> to vector<2x32xf32>
    %113 = arith.divf %111, %112 : vector<2x32xf32>
    %c0_60 = arith.constant 0 : index
    %c0_61 = arith.constant 0 : index
    %114 = vector.load %arg15[%c0_60, %c0_61] : memref<32x10xf32, #tpu.memory_space<vmem>>, vector<32x10xf32>
    %cst_62 = arith.constant dense<0.000000e+00> : vector<2x10xf32>
    %115 = tpu.matmul %113, %114, %cst_62 {dimension_numbers = #tpu.dot_dimension_numbers<[1], [0], [0], [1], [0, 0, 1, 1], [], []>} : vector<2x32xf32>, vector<32x10xf32>, vector<2x10xf32> -> vector<2x10xf32>
    %c0_63 = arith.constant 0 : index
    %c0_64 = arith.constant 0 : index
    %116 = vector.load %arg16[%c0_63, %c0_64] : memref<1x10xf32, #tpu.memory_space<vmem>>, vector<1x10xf32>
    %117 = vector.broadcast %116 : vector<1x10xf32> to vector<2x10xf32>
    %118 = arith.addf %115, %117 : vector<2x10xf32>
    %cst_65 = arith.constant dense<0xFF800000> : vector<2xf32>
    %119 = vector.multi_reduction <maximumf>, %118, %cst_65 [1] : vector<2x10xf32> to vector<2xf32>
    %120 = vector.shape_cast %119 : vector<2xf32> to vector<2x1xf32>
    %121 = vector.broadcast %120 : vector<2x1xf32> to vector<2x10xf32>
    %122 = arith.subf %118, %121 : vector<2x10xf32>
    %123 = math.exp %122 : vector<2x10xf32>
    %cst_66 = arith.constant dense<0.000000e+00> : vector<2xf32>
    %124 = vector.multi_reduction <add>, %123, %cst_66 [1] : vector<2x10xf32> to vector<2xf32>
    %125 = vector.shape_cast %124 : vector<2xf32> to vector<2x1xf32>
    %126 = math.log %125 : vector<2x1xf32>
    %127 = vector.broadcast %126 : vector<2x1xf32> to vector<2x10xf32>
    %128 = arith.subf %122, %127 : vector<2x10xf32>
    %c0_67 = arith.constant 0 : index
    %c0_68 = arith.constant 0 : index
    %129 = vector.load %arg18[%c0_67, %c0_68] : memref<2x10xf32, #tpu.memory_space<vmem>>, vector<2x10xf32>
    tpu.vector_store %arg18[%c0_67, %c0_68], %128 {strides = array<i32>} : memref<2x10xf32, #tpu.memory_space<vmem>>, vector<2x10xf32>,
    return
  }
}

</mosaic_0001>

<bundles_post_ra>
// kernel: forward.2
= control target key start
LH: loop header
LB: loop body
LE: loop exit
PB: predicated region body
PF: predicated region fallthrough
CT: control target
= control target key end

     0   :  { %vm595_vm0 = vcmask 1040384   ;;  %vm162_vm1 = vcmask 203776   ;;  %vm1232_vm2 = vcmask 80896   ;;  %s2224_s1 = inlined_call_operand.vmem [shape: f32[25,10], index: 1, kind: input, shape index: {}]   ;;  %s2225_s0 = inlined_call_operand.vmem [shape: f32[1152,25], index: 0, kind: input, shape index: {}]   ;;  %s2226_s2 = inlined_call_operand.vmem [shape: f32[1,10], index: 2, kind: input, shape index: {}]   ;;  %s2227_s3 = inlined_call_operand.vmem [shape: f32[288,10], index: 3, kind: output, shape index: {}]  }
   0x1   :  { %v161_v0 = vld [vmem:[%s2224_s1 + $0x18] sm:$0x1]  ;;  %v160_v1 = vld [vmem:[%s2224_s1 + $0x10] sm:$0xff]  ;;  %v159_v2 = vld [vmem:[%s2224_s1 + $0x8] sm:$0xff] }
   0x2   :  { %1419 = vmatpush.msk.msra.mxu2 %vm595_vm0, %v161_v0  ;;  %1420 = vmatpush.msk.msra.mxu3 %vm595_vm0, %v161_v0  ;;  %v158_v3 = vld [vmem:[%s2224_s1] sm:$0xff]  ;;  %v87_v8 = vld [vmem:[%s2225_s0 + $0x248] sm:$0xff]  ;;  %v88_v12 = vld [vmem:[%s2225_s0 + $0x250] sm:$0xff] }
   0x3   :  { %1273 = vmatpush.msk.msra.mxu0 %vm595_vm0, %v161_v0  ;;  %1418 = vmatpush.msk.msra.mxu1 %vm595_vm0, %v161_v0  ;;  %v86_v4 = vld [vmem:[%s2225_s0 + $0x240] sm:$0xff]  ;;  %v123_v9 = vld [vmem:[%s2225_s0 + $0x368] sm:$0xff]  ;;  %v124_v13 = vld [vmem:[%s2225_s0 + $0x370] sm:$0xff] }
   0x4   :  { %1422 = vmatpush.msra.mxu2 %v160_v1  ;;  %1423 = vmatpush.msra.mxu3 %v160_v1  ;;  %v122_v5 = vld [vmem:[%s2225_s0 + $0x360] sm:$0xff]  ;;  %v15_v10 = vld [vmem:[%s2225_s0 + $0x8] sm:$0xff]  ;;  %v16_v14 = vld [vmem:[%s2225_s0 + $0x10] sm:$0xff] }
   0x5   :  { %612 = vmatpush.msra.mxu0 %v160_v1  ;;  %1421 = vmatpush.msra.mxu1 %v160_v1  ;;  %v14_v6 = vld [vmem:[%s2225_s0] sm:$0xff]  ;;  %v51_v11 = vld [vmem:[%s2225_s0 + $0x128] sm:$0xff]  ;;  %v52_v15 = vld [vmem:[%s2225_s0 + $0x130] sm:$0xff] }
   0x6   :  { %1425 = vmatpush.msra.mxu2 %v159_v2  ;;  %1426 = vmatpush.msra.mxu3 %v159_v2  ;;  %v50_v7 = vld [vmem:[%s2225_s0 + $0x120] sm:$0xff]  ;;  %v89_v16 = vld [vmem:[%s2225_s0 + $0x258] sm:$0xff]  ;;  %v91_v24 = vld [vmem:[%s2225_s0 + $0x268] sm:$0xff] }
   0x7   :  { %613 = vmatpush.msra.mxu0 %v159_v2  ;;  %1424 = vmatpush.msra.mxu1 %v159_v2  ;;  %v125_v17 = vld [vmem:[%s2225_s0 + $0x378] sm:$0xff]  ;;  %v90_v20 = vld [vmem:[%s2225_s0 + $0x260] sm:$0xff]  ;;  %v127_v25 = vld [vmem:[%s2225_s0 + $0x388] sm:$0xff] }
   0x8   :  { %1428 = vmatpush.msra.mxu2 %v158_v3  ;;  %1429 = vmatpush.msra.mxu3 %v158_v3  ;;  %v17_v18 = vld [vmem:[%s2225_s0 + $0x18] sm:$0xff]  ;;  %v126_v21 = vld [vmem:[%s2225_s0 + $0x380] sm:$0xff]  ;;  %v19_v26 = vld [vmem:[%s2225_s0 + $0x28] sm:$0xff] }
   0x9   :  { %1346 = vmatmul.msk.f32.vlgmr.msra.gmra.mxu2 %vm162_vm1, %v86_v4  ;;  %1382 = vmatmul.msk.f32.vlgmr.msra.gmra.mxu3 %vm162_vm1, %v122_v5  ;;  %v53_v19 = vld [vmem:[%s2225_s0 + $0x138] sm:$0xff]  ;;  %v18_v22 = vld [vmem:[%s2225_s0 + $0x20] sm:$0xff]  ;;  %v55_v27 = vld [vmem:[%s2225_s0 + $0x148] sm:$0xff] }
   0xa   :  { %614 = vmatpush.msra.mxu0 %v158_v3  ;;  %1427 = vmatpush.msra.mxu1 %v158_v3  ;;  %v54_v23 = vld [vmem:[%s2225_s0 + $0x140] sm:$0xff]  ;;  %v92_v28 = vld [vmem:[%s2225_s0 + $0x270] sm:$0xff]  ;;  %v93_v32 = vld [vmem:[%s2225_s0 + $0x278] sm:$0xff] }
   0xb   :  { %1274 = vmatmul.msk.f32.vlgmr.msra.gmra.mxu0 %vm162_vm1, %v14_v6  ;;  %1310 = vmatmul.msk.f32.vlgmr.msra.gmra.mxu1 %vm162_vm1, %v50_v7  ;;  %v128_v29 = vld [vmem:[%s2225_s0 + $0x390] sm:$0xff]  ;;  %v129_v33 = vld [vmem:[%s2225_s0 + $0x398] sm:$0xff]  ;;  %v94_v36 = vld [vmem:[%s2225_s0 + $0x280] sm:$0xff] }
   0xc   :  { %v20_v30 = vld [vmem:[%s2225_s0 + $0x30] sm:$0xff]  ;;  %v21_v34 = vld [vmem:[%s2225_s0 + $0x38] sm:$0xff]  ;;  %v130_v37 = vld [vmem:[%s2225_s0 + $0x3a0] sm:$0xff] }
   0xd   :  { %v56_v31 = vld [vmem:[%s2225_s0 + $0x150] sm:$0xff]  ;;  %v57_v35 = vld [vmem:[%s2225_s0 + $0x158] sm:$0xff]  ;;  %v22_v38 = vld [vmem:[%s2225_s0 + $0x40] sm:$0xff] }
   0xe   :  { %v58_v39 = vld [vmem:[%s2225_s0 + $0x160] sm:$0xff]  ;;  %v95_v40 = vld [vmem:[%s2225_s0 + $0x288] sm:$0xff]  ;;  %v96_v44 = vld [vmem:[%s2225_s0 + $0x290] sm:$0xff] }
   0xf   :  { %v131_v41 = vld [vmem:[%s2225_s0 + $0x3a8] sm:$0xff]  ;;  %v132_v45 = vld [vmem:[%s2225_s0 + $0x3b0] sm:$0xff]  ;;  %v97_v48 = vld [vmem:[%s2225_s0 + $0x298] sm:$0xff] }
  0x10   :  { %v23_v42 = vld [vmem:[%s2225_s0 + $0x48] sm:$0xff]  ;;  %v24_v46 = vld [vmem:[%s2225_s0 + $0x50] sm:$0xff]  ;;  %v133_v49 = vld [vmem:[%s2225_s0 + $0x3b8] sm:$0xff] }
  0x11   :  { %1347 = vmatmul.msk.f32.gmra.mxu2 %vm162_vm1, %v87_v8  ;;  %1383 = vmatmul.msk.f32.gmra.mxu3 %vm162_vm1, %v123_v9  ;;  %v59_v43 = vld [vmem:[%s2225_s0 + $0x168] sm:$0xff]  ;;  %v60_v47 = vld [vmem:[%s2225_s0 + $0x170] sm:$0xff]  ;;  %v25_v50 = vld [vmem:[%s2225_s0 + $0x58] sm:$0xff] }
  0x12   :  { %v61_v51 = vld [vmem:[%s2225_s0 + $0x178] sm:$0xff]  ;;  %v98_v52 = vld [vmem:[%s2225_s0 + $0x2a0] sm:$0xff]  ;;  %v99_v56 = vld [vmem:[%s2225_s0 + $0x2a8] sm:$0xff] }
  0x13   :  { %1275 = vmatmul.msk.f32.gmra.mxu0 %vm162_vm1, %v15_v10  ;;  %1311 = vmatmul.msk.f32.gmra.mxu1 %vm162_vm1, %v51_v11  ;;  %v134_v53 = vld [vmem:[%s2225_s0 + $0x3c0] sm:$0xff]  ;;  %v135_v57 = vld [vmem:[%s2225_s0 + $0x3c8] sm:$0xff]  ;;  %v100_v60 = vld [vmem:[%s2225_s0 + $0x2b0] sm:$0xff] }
  0x14   :  { %v26_v54 = vld [vmem:[%s2225_s0 + $0x60] sm:$0xff]  ;;  %v27_v58 = vld [vmem:[%s2225_s0 + $0x68] sm:$0xff]  ;;  %v136_v61 = vld [vmem:[%s2225_s0 + $0x3d0] sm:$0xff] }
  0x15   :  { %v62_v55 = vld [vmem:[%s2225_s0 + $0x180] sm:$0xff]  ;;  %v63_v59 = vld [vmem:[%s2225_s0 + $0x188] sm:$0xff]  ;;  %v28_v62 = vld [vmem:[%s2225_s0 + $0x70] sm:$0xff] }
  0x16   :  { %v64_v63 = vld [vmem:[%s2225_s0 + $0x190] sm:$0xff]  ;;  %v101_v0 = vld [vmem:[%s2225_s0 + $0x2b8] sm:$0xff]  ;;  %v102_v4 = vld [vmem:[%s2225_s0 + $0x2c0] sm:$0xff] }
  0x17   :  { %v137_v1 = vld [vmem:[%s2225_s0 + $0x3d8] sm:$0xff]  ;;  %v138_v5 = vld [vmem:[%s2225_s0 + $0x3e0] sm:$0xff] }
  0x18   :  { %v29_v2 = vld [vmem:[%s2225_s0 + $0x78] sm:$0xff]  ;;  %v30_v8 = vld [vmem:[%s2225_s0 + $0x80] sm:$0xff] }
  0x19   :  { %1348 = vmatmul.msk.f32.gmra.mxu2 %vm162_vm1, %v88_v12  ;;  %1384 = vmatmul.msk.f32.gmra.mxu3 %vm162_vm1, %v124_v13  ;;  %v65_v3 = vld [vmem:[%s2225_s0 + $0x198] sm:$0xff]  ;;  %v66_v9 = vld [vmem:[%s2225_s0 + $0x1a0] sm:$0xff] }
  0x1b   :  { %1276 = vmatmul.msk.f32.gmra.mxu0 %vm162_vm1, %v16_v14  ;;  %1312 = vmatmul.msk.f32.gmra.mxu1 %vm162_vm1, %v52_v15  ;;  %v1738_v14 = vld [vmem:[%s2226_s2] ss:$0 sm:$0xff]  ;;  %v103_v15 = vld [vmem:[%s2225_s0 + $0x2c8] sm:$0xff] }
  0x21   :  { %1349 = vmatmul.msk.f32.gmra.mxu2 %vm162_vm1, %v89_v16  ;;  %1385 = vmatmul.msk.f32.gmra.mxu3 %vm162_vm1, %v125_v17  ;;  %v139_v16 = vld [vmem:[%s2225_s0 + $0x3e8] sm:$0xff] }
  0x23   :  { %1277 = vmatmul.msk.f32.gmra.mxu0 %vm162_vm1, %v17_v18  ;;  %1313 = vmatmul.msk.f32.gmra.mxu1 %vm162_vm1, %v53_v19 }
  0x29   :  { %1350 = vmatmul.msk.f32.gmra.mxu2 %vm162_vm1, %v90_v20  ;;  %1386 = vmatmul.msk.f32.gmra.mxu3 %vm162_vm1, %v126_v21  ;;  %v31_v20 = vld [vmem:[%s2225_s0 + $0x88] sm:$0xff] }
  0x2a   :  { %v67_v21 = vld [vmem:[%s2225_s0 + $0x1a8] sm:$0xff] }
  0x2b   :  { %1278 = vmatmul.msk.f32.gmra.mxu0 %vm162_vm1, %v18_v22  ;;  %1314 = vmatmul.msk.f32.gmra.mxu1 %vm162_vm1, %v54_v23 }
  0x31   :  { %1351 = vmatmul.msk.f32.gmra.mxu2 %vm162_vm1, %v91_v24  ;;  %1387 = vmatmul.msk.f32.gmra.mxu3 %vm162_vm1, %v127_v25 }
  0x33   :  { %1279 = vmatmul.msk.f32.gmra.mxu0 %vm162_vm1, %v19_v26  ;;  %1315 = vmatmul.msk.f32.gmra.mxu1 %vm162_vm1, %v55_v27 }
  0x39   :  { %1352 = vmatmul.msk.f32.gmra.mxu2 %vm162_vm1, %v92_v28  ;;  %1388 = vmatmul.msk.f32.gmra.mxu3 %vm162_vm1, %v128_v29  ;;  %v104_v28 = vld [vmem:[%s2225_s0 + $0x2d0] sm:$0xff] }
  0x3a   :  { %v140_v29 = vld [vmem:[%s2225_s0 + $0x3f0] sm:$0xff] }
  0x3b   :  { %1280 = vmatmul.msk.f32.gmra.mxu0 %vm162_vm1, %v20_v30  ;;  %1316 = vmatmul.msk.f32.gmra.mxu1 %vm162_vm1, %v56_v31 }
  0x41   :  { %1353 = vmatmul.msk.f32.gmra.mxu2 %vm162_vm1, %v93_v32  ;;  %1389 = vmatmul.msk.f32.gmra.mxu3 %vm162_vm1, %v129_v33  ;;  %v32_v33 = vld [vmem:[%s2225_s0 + $0x90] sm:$0xff] }
  0x43   :  { %1281 = vmatmul.msk.f32.gmra.mxu0 %vm162_vm1, %v21_v34  ;;  %1317 = vmatmul.msk.f32.gmra.mxu1 %vm162_vm1, %v57_v35  ;;  %v68_v34 = vld [vmem:[%s2225_s0 + $0x1b0] sm:$0xff] }
  0x49   :  { %1354 = vmatmul.msk.f32.gmra.mxu2 %vm162_vm1, %v94_v36  ;;  %1390 = vmatmul.msk.f32.gmra.mxu3 %vm162_vm1, %v130_v37 }
  0x4b   :  { %1282 = vmatmul.msk.f32.gmra.mxu0 %vm162_vm1, %v22_v38  ;;  %1318 = vmatmul.msk.f32.gmra.mxu1 %vm162_vm1, %v58_v39 }
  0x51   :  { %1355 = vmatmul.msk.f32.gmra.mxu2 %vm162_vm1, %v95_v40  ;;  %1391 = vmatmul.msk.f32.gmra.mxu3 %vm162_vm1, %v131_v41  ;;  %v105_v41 = vld [vmem:[%s2225_s0 + $0x2d8] sm:$0xff] }
  0x53   :  { %1283 = vmatmul.msk.f32.gmra.mxu0 %vm162_vm1, %v23_v42  ;;  %1319 = vmatmul.msk.f32.gmra.mxu1 %vm162_vm1, %v59_v43  ;;  %v141_v42 = vld [vmem:[%s2225_s0 + $0x3f8] sm:$0xff] }
  0x59   :  { %1356 = vmatmul.msk.f32.gmra.mxu2 %vm162_vm1, %v96_v44  ;;  %1392 = vmatmul.msk.f32.gmra.mxu3 %vm162_vm1, %v132_v45 }
  0x5b   :  { %1284 = vmatmul.msk.f32.gmra.mxu0 %vm162_vm1, %v24_v46  ;;  %1320 = vmatmul.msk.f32.gmra.mxu1 %vm162_vm1, %v60_v47  ;;  %v33_v46 = vld [vmem:[%s2225_s0 + $0x98] sm:$0xff] }
  0x5c   :  { %v69_v47 = vld [vmem:[%s2225_s0 + $0x1b8] sm:$0xff] }
  0x61   :  { %1357 = vmatmul.msk.f32.gmra.mxu2 %vm162_vm1, %v97_v48  ;;  %1393 = vmatmul.msk.f32.gmra.mxu3 %vm162_vm1, %v133_v49 }
  0x63   :  { %1285 = vmatmul.msk.f32.gmra.mxu0 %vm162_vm1, %v25_v50  ;;  %1321 = vmatmul.msk.f32.gmra.mxu1 %vm162_vm1, %v61_v51 }
  0x69   :  { %1358 = vmatmul.msk.f32.gmra.mxu2 %vm162_vm1, %v98_v52  ;;  %1394 = vmatmul.msk.f32.gmra.mxu3 %vm162_vm1, %v134_v53 }
  0x6b   :  { %1286 = vmatmul.msk.f32.gmra.mxu0 %vm162_vm1, %v26_v54  ;;  %1322 = vmatmul.msk.f32.gmra.mxu1 %vm162_vm1, %v62_v55  ;;  %v106_v54 = vld [vmem:[%s2225_s0 + $0x2e0] sm:$0xff] }
  0x6c   :  { %v142_v55 = vld [vmem:[%s2225_s0 + $0x400] sm:$0xff] }
  0x71   :  { %1359 = vmatmul.msk.f32.gmra.mxu2 %vm162_vm1, %v99_v56  ;;  %1395 = vmatmul.msk.f32.gmra.mxu3 %vm162_vm1, %v135_v57 }
  0x73   :  { %1287 = vmatmul.msk.f32.gmra.mxu0 %vm162_vm1, %v27_v58  ;;  %1323 = vmatmul.msk.f32.gmra.mxu1 %vm162_vm1, %v63_v59  ;;  %v34_v59 = vld [vmem:[%s2225_s0 + $0xa0] sm:$0xff] }
  0x79   :  { %1360 = vmatmul.msk.f32.gmra.mxu2 %vm162_vm1, %v100_v60  ;;  %1396 = vmatmul.msk.f32.gmra.mxu3 %vm162_vm1, %v136_v61  ;;  %v70_v60 = vld [vmem:[%s2225_s0 + $0x1c0] sm:$0xff] }
  0x7b   :  { %1288 = vmatmul.msk.f32.gmra.mxu0 %vm162_vm1, %v28_v62  ;;  %1324 = vmatmul.msk.f32.gmra.mxu1 %vm162_vm1, %v64_v63 }
  0x81   :  { %1361 = vmatmul.msk.f32.gmra.mxu2 %vm162_vm1, %v101_v0  ;;  %1397 = vmatmul.msk.f32.gmra.mxu3 %vm162_vm1, %v137_v1 }
  0x83   :  { %1289 = vmatmul.msk.f32.gmra.mxu0 %vm162_vm1, %v29_v2  ;;  %1325 = vmatmul.msk.f32.gmra.mxu1 %vm162_vm1, %v65_v3  ;;  %v107_v3 = vld [vmem:[%s2225_s0 + $0x2e8] sm:$0xff] }
  0x88   :  { %v616_v6 = vpop.f32.mrf.mxu0  ;;  %v724_v7 = vpop.f32.mrf.mxu1 }
  0x89   :  { %1362 = vmatmul.msk.f32.gmra.mxu2 %vm162_vm1, %v102_v4  ;;  %1398 = vmatmul.msk.f32.gmra.mxu3 %vm162_vm1, %v138_v5  ;;  %v1048_v10 = vmax.f32 %v616_v6, %v724_v7  ;;  %v143_v4 = vld [vmem:[%s2225_s0 + $0x408] sm:$0xff] }
  0x8b   :  { %1290 = vmatmul.msk.f32.gmra.mxu0 %vm162_vm1, %v30_v8  ;;  %1326 = vmatmul.msk.f32.gmra.mxu1 %vm162_vm1, %v66_v9  ;;  %v35_v8 = vld [vmem:[%s2225_s0 + $0xa8] sm:$0xff] }
  0x8c   :  { %v832_v11 = vpop.f32.mrf.mxu2  ;;  %v940_v12 = vpop.f32.mrf.mxu3  ;;  %v71_v9 = vld [vmem:[%s2225_s0 + $0x1c8] sm:$0xff] }
  0x8d   :  { %v1084_v13 = vmax.f32 %v832_v11, %v940_v12 }
  0x8f   :  { %v1120_v17 = vmax.f32 %v1048_v10, %v1084_v13 }
  0x90   :  { %v619_v18 = vpop.f32.mrf.mxu0  ;;  %v727_v19 = vpop.f32.mrf.mxu1 }
  0x91   :  { %v1160_v22 = vadd.f32 %v1738_v14, %v1120_v17  ;;  %1363 = vmatmul.msk.f32.gmra.mxu2 %vm162_vm1, %v103_v15  ;;  %1399 = vmatmul.msk.f32.gmra.mxu3 %vm162_vm1, %v139_v16  ;;  %v1049_v24 = vmax.f32 %v619_v18, %v727_v19  ;;  %v108_v17 = vld [vmem:[%s2225_s0 + $0x2f0] sm:$0xff] }
  0x92   :  { %v144_v18 = vld [vmem:[%s2225_s0 + $0x410] sm:$0xff] }
  0x93   :  { %v1196_v23 = vmax.f32 %v1160_v22, 0.0  ;;  %1291 = vmatmul.msk.f32.gmra.mxu0 %vm162_vm1, %v31_v20  ;;  %1327 = vmatmul.msk.f32.gmra.mxu1 %vm162_vm1, %v67_v21  ;;  %v36_v22 = vld [vmem:[%s2225_s0 + $0xb0] sm:$0xff] }
  0x94   :  { %v835_v25 = vpop.f32.mrf.mxu2  ;;  %v943_v26 = vpop.f32.mrf.mxu3 }
  0x95   :  { %1233 = vst.msk [vmem:[%s2227_s3] sm:$0xff] %vm1232_vm2, %v1196_v23  ;;  %v1085_v27 = vmax.f32 %v835_v25, %v943_v26  ;;  %v72_v23 = vld [vmem:[%s2225_s0 + $0x1d0] sm:$0xff] }
  0x97   :  { %v1121_v30 = vmax.f32 %v1049_v24, %v1085_v27 }
  0x98   :  { %v622_v31 = vpop.f32.mrf.mxu0  ;;  %v730_v32 = vpop.f32.mrf.mxu1 }
  0x99   :  { %v1161_v35 = vadd.f32 %v1738_v14, %v1121_v30  ;;  %1364 = vmatmul.msk.f32.gmra.mxu2 %vm162_vm1, %v104_v28  ;;  %1400 = vmatmul.msk.f32.gmra.mxu3 %vm162_vm1, %v140_v29  ;;  %v1050_v37 = vmax.f32 %v622_v31, %v730_v32  ;;  %v109_v30 = vld [vmem:[%s2225_s0 + $0x2f8] sm:$0xff] }
  0x9a   :  { %v145_v31 = vld [vmem:[%s2225_s0 + $0x418] sm:$0xff] }
  0x9b   :  { %v1197_v36 = vmax.f32 %v1161_v35, 0.0  ;;  %1292 = vmatmul.msk.f32.gmra.mxu0 %vm162_vm1, %v32_v33  ;;  %1328 = vmatmul.msk.f32.gmra.mxu1 %vm162_vm1, %v68_v34  ;;  %v37_v35 = vld [vmem:[%s2225_s0 + $0xb8] sm:$0xff] }
  0x9c   :  { %v838_v38 = vpop.f32.mrf.mxu2  ;;  %v946_v39 = vpop.f32.mrf.mxu3 }
  0x9d   :  { %1234 = vst.msk [vmem:[%s2227_s3 + $0x8] sm:$0xff] %vm1232_vm2, %v1197_v36  ;;  %v1086_v40 = vmax.f32 %v838_v38, %v946_v39  ;;  %v73_v36 = vld [vmem:[%s2225_s0 + $0x1d8] sm:$0xff] }
  0x9f   :  { %v1122_v43 = vmax.f32 %v1050_v37, %v1086_v40 }
  0xa0   :  { %v625_v44 = vpop.f32.mrf.mxu0  ;;  %v733_v45 = vpop.f32.mrf.mxu1 }
  0xa1   :  { %v1162_v48 = vadd.f32 %v1738_v14, %v1122_v43  ;;  %1365 = vmatmul.msk.f32.gmra.mxu2 %vm162_vm1, %v105_v41  ;;  %1401 = vmatmul.msk.f32.gmra.mxu3 %vm162_vm1, %v141_v42  ;;  %v1051_v50 = vmax.f32 %v625_v44, %v733_v45  ;;  %v110_v43 = vld [vmem:[%s2225_s0 + $0x300] sm:$0xff] }
  0xa2   :  { %v146_v44 = vld [vmem:[%s2225_s0 + $0x420] sm:$0xff] }
  0xa3   :  { %v1198_v49 = vmax.f32 %v1162_v48, 0.0  ;;  %1293 = vmatmul.msk.f32.gmra.mxu0 %vm162_vm1, %v33_v46  ;;  %1329 = vmatmul.msk.f32.gmra.mxu1 %vm162_vm1, %v69_v47  ;;  %v38_v48 = vld [vmem:[%s2225_s0 + $0xc0] sm:$0xff] }
  0xa4   :  { %v841_v51 = vpop.f32.mrf.mxu2  ;;  %v949_v52 = vpop.f32.mrf.mxu3 }
  0xa5   :  { %1235 = vst.msk [vmem:[%s2227_s3 + $0x10] sm:$0xff] %vm1232_vm2, %v1198_v49  ;;  %v1087_v53 = vmax.f32 %v841_v51, %v949_v52  ;;  %v74_v49 = vld [vmem:[%s2225_s0 + $0x1e0] sm:$0xff] }
  0xa7   :  { %v1123_v56 = vmax.f32 %v1051_v50, %v1087_v53 }
  0xa8   :  { %v628_v57 = vpop.f32.mrf.mxu0  ;;  %v736_v58 = vpop.f32.mrf.mxu1 }
  0xa9   :  { %v1163_v61 = vadd.f32 %v1738_v14, %v1123_v56  ;;  %1366 = vmatmul.msk.f32.gmra.mxu2 %vm162_vm1, %v106_v54  ;;  %1402 = vmatmul.msk.f32.gmra.mxu3 %vm162_vm1, %v142_v55  ;;  %v1052_v63 = vmax.f32 %v628_v57, %v736_v58  ;;  %v111_v56 = vld [vmem:[%s2225_s0 + $0x308] sm:$0xff] }
  0xaa   :  { %v147_v57 = vld [vmem:[%s2225_s0 + $0x428] sm:$0xff] }
  0xab   :  { %v1199_v62 = vmax.f32 %v1163_v61, 0.0  ;;  %1294 = vmatmul.msk.f32.gmra.mxu0 %vm162_vm1, %v34_v59  ;;  %1330 = vmatmul.msk.f32.gmra.mxu1 %vm162_vm1, %v70_v60  ;;  %v39_v61 = vld [vmem:[%s2225_s0 + $0xc8] sm:$0xff] }
  0xac   :  { %v844_v0 = vpop.f32.mrf.mxu2  ;;  %v952_v1 = vpop.f32.mrf.mxu3 }
  0xad   :  { %1236 = vst.msk [vmem:[%s2227_s3 + $0x18] sm:$0xff] %vm1232_vm2, %v1199_v62  ;;  %v1088_v2 = vmax.f32 %v844_v0, %v952_v1  ;;  %v75_v62 = vld [vmem:[%s2225_s0 + $0x1e8] sm:$0xff] }
  0xaf   :  { %v1124_v5 = vmax.f32 %v1052_v63, %v1088_v2 }
  0xb0   :  { %v631_v6 = vpop.f32.mrf.mxu0  ;;  %v739_v7 = vpop.f32.mrf.mxu1 }
  0xb1   :  { %v1164_v10 = vadd.f32 %v1738_v14, %v1124_v5  ;;  %1367 = vmatmul.msk.f32.gmra.mxu2 %vm162_vm1, %v107_v3  ;;  %1403 = vmatmul.msk.f32.gmra.mxu3 %vm162_vm1, %v143_v4  ;;  %v1053_v12 = vmax.f32 %v631_v6, %v739_v7  ;;  %v112_v5 = vld [vmem:[%s2225_s0 + $0x310] sm:$0xff] }
  0xb2   :  { %v148_v6 = vld [vmem:[%s2225_s0 + $0x430] sm:$0xff] }
  0xb3   :  { %v1200_v11 = vmax.f32 %v1164_v10, 0.0  ;;  %1295 = vmatmul.msk.f32.gmra.mxu0 %vm162_vm1, %v35_v8  ;;  %1331 = vmatmul.msk.f32.gmra.mxu1 %vm162_vm1, %v71_v9  ;;  %v40_v10 = vld [vmem:[%s2225_s0 + $0xd0] sm:$0xff] }
  0xb4   :  { %v847_v13 = vpop.f32.mrf.mxu2  ;;  %v955_v15 = vpop.f32.mrf.mxu3 }
  0xb5   :  { %1237 = vst.msk [vmem:[%s2227_s3 + $0x20] sm:$0xff] %vm1232_vm2, %v1200_v11  ;;  %v1089_v16 = vmax.f32 %v847_v13, %v955_v15  ;;  %v76_v11 = vld [vmem:[%s2225_s0 + $0x1f0] sm:$0xff] }
  0xb7   :  { %v1125_v19 = vmax.f32 %v1053_v12, %v1089_v16 }
  0xb8   :  { %v634_v20 = vpop.f32.mrf.mxu0  ;;  %v742_v21 = vpop.f32.mrf.mxu1 }
  0xb9   :  { %v1165_v24 = vadd.f32 %v1738_v14, %v1125_v19  ;;  %1368 = vmatmul.msk.f32.gmra.mxu2 %vm162_vm1, %v108_v17  ;;  %1404 = vmatmul.msk.f32.gmra.mxu3 %vm162_vm1, %v144_v18  ;;  %v1054_v26 = vmax.f32 %v634_v20, %v742_v21  ;;  %v113_v19 = vld [vmem:[%s2225_s0 + $0x318] sm:$0xff] }
  0xba   :  { %v149_v20 = vld [vmem:[%s2225_s0 + $0x438] sm:$0xff] }
  0xbb   :  { %v1201_v25 = vmax.f32 %v1165_v24, 0.0  ;;  %1296 = vmatmul.msk.f32.gmra.mxu0 %vm162_vm1, %v36_v22  ;;  %1332 = vmatmul.msk.f32.gmra.mxu1 %vm162_vm1, %v72_v23  ;;  %v41_v24 = vld [vmem:[%s2225_s0 + $0xd8] sm:$0xff] }
  0xbc   :  { %v850_v27 = vpop.f32.mrf.mxu2  ;;  %v958_v28 = vpop.f32.mrf.mxu3 }
  0xbd   :  { %1238 = vst.msk [vmem:[%s2227_s3 + $0x28] sm:$0xff] %vm1232_vm2, %v1201_v25  ;;  %v1090_v29 = vmax.f32 %v850_v27, %v958_v28  ;;  %v77_v25 = vld [vmem:[%s2225_s0 + $0x1f8] sm:$0xff] }
  0xbf   :  { %v1126_v32 = vmax.f32 %v1054_v26, %v1090_v29 }
  0xc0   :  { %v637_v33 = vpop.f32.mrf.mxu0  ;;  %v745_v34 = vpop.f32.mrf.mxu1 }
  0xc1   :  { %v1166_v37 = vadd.f32 %v1738_v14, %v1126_v32  ;;  %1369 = vmatmul.msk.f32.gmra.mxu2 %vm162_vm1, %v109_v30  ;;  %1405 = vmatmul.msk.f32.gmra.mxu3 %vm162_vm1, %v145_v31  ;;  %v1055_v39 = vmax.f32 %v637_v33, %v745_v34  ;;  %v114_v32 = vld [vmem:[%s2225_s0 + $0x320] sm:$0xff] }
  0xc2   :  { %v150_v33 = vld [vmem:[%s2225_s0 + $0x440] sm:$0xff] }
  0xc3   :  { %v1202_v38 = vmax.f32 %v1166_v37, 0.0  ;;  %1297 = vmatmul.msk.f32.gmra.mxu0 %vm162_vm1, %v37_v35  ;;  %1333 = vmatmul.msk.f32.gmra.mxu1 %vm162_vm1, %v73_v36  ;;  %v42_v37 = vld [vmem:[%s2225_s0 + $0xe0] sm:$0xff] }
  0xc4   :  { %v853_v40 = vpop.f32.mrf.mxu2  ;;  %v961_v41 = vpop.f32.mrf.mxu3 }
  0xc5   :  { %1239 = vst.msk [vmem:[%s2227_s3 + $0x30] sm:$0xff] %vm1232_vm2, %v1202_v38  ;;  %v1091_v42 = vmax.f32 %v853_v40, %v961_v41  ;;  %v78_v38 = vld [vmem:[%s2225_s0 + $0x200] sm:$0xff] }
  0xc7   :  { %v1127_v45 = vmax.f32 %v1055_v39, %v1091_v42 }
  0xc8   :  { %v640_v46 = vpop.f32.mrf.mxu0  ;;  %v748_v47 = vpop.f32.mrf.mxu1 }
  0xc9   :  { %v1167_v50 = vadd.f32 %v1738_v14, %v1127_v45  ;;  %1370 = vmatmul.msk.f32.gmra.mxu2 %vm162_vm1, %v110_v43  ;;  %1406 = vmatmul.msk.f32.gmra.mxu3 %vm162_vm1, %v146_v44  ;;  %v1056_v52 = vmax.f32 %v640_v46, %v748_v47  ;;  %v115_v45 = vld [vmem:[%s2225_s0 + $0x328] sm:$0xff] }
  0xca   :  { %v151_v46 = vld [vmem:[%s2225_s0 + $0x448] sm:$0xff] }
  0xcb   :  { %v1203_v51 = vmax.f32 %v1167_v50, 0.0  ;;  %1298 = vmatmul.msk.f32.gmra.mxu0 %vm162_vm1, %v38_v48  ;;  %1334 = vmatmul.msk.f32.gmra.mxu1 %vm162_vm1, %v74_v49  ;;  %v43_v50 = vld [vmem:[%s2225_s0 + $0xe8] sm:$0xff] }
  0xcc   :  { %v856_v53 = vpop.f32.mrf.mxu2  ;;  %v964_v54 = vpop.f32.mrf.mxu3 }
  0xcd   :  { %1240 = vst.msk [vmem:[%s2227_s3 + $0x38] sm:$0xff] %vm1232_vm2, %v1203_v51  ;;  %v1092_v55 = vmax.f32 %v856_v53, %v964_v54  ;;  %v79_v51 = vld [vmem:[%s2225_s0 + $0x208] sm:$0xff] }
  0xcf   :  { %v1128_v58 = vmax.f32 %v1056_v52, %v1092_v55 }
  0xd0   :  { %v643_v59 = vpop.f32.mrf.mxu0  ;;  %v751_v60 = vpop.f32.mrf.mxu1 }
  0xd1   :  { %v1168_v63 = vadd.f32 %v1738_v14, %v1128_v58  ;;  %1371 = vmatmul.msk.f32.gmra.mxu2 %vm162_vm1, %v111_v56  ;;  %1407 = vmatmul.msk.f32.gmra.mxu3 %vm162_vm1, %v147_v57  ;;  %v1057_v1 = vmax.f32 %v643_v59, %v751_v60  ;;  %v116_v58 = vld [vmem:[%s2225_s0 + $0x330] sm:$0xff] }
  0xd2   :  { %v152_v59 = vld [vmem:[%s2225_s0 + $0x450] sm:$0xff] }
  0xd3   :  { %v1204_v0 = vmax.f32 %v1168_v63, 0.0  ;;  %1299 = vmatmul.msk.f32.gmra.mxu0 %vm162_vm1, %v39_v61  ;;  %1335 = vmatmul.msk.f32.gmra.mxu1 %vm162_vm1, %v75_v62  ;;  %v44_v63 = vld [vmem:[%s2225_s0 + $0xf0] sm:$0xff] }
  0xd4   :  { %v859_v2 = vpop.f32.mrf.mxu2  ;;  %v967_v3 = vpop.f32.mrf.mxu3 }
  0xd5   :  { %1241 = vst.msk [vmem:[%s2227_s3 + $0x40] sm:$0xff] %vm1232_vm2, %v1204_v0  ;;  %v1093_v4 = vmax.f32 %v859_v2, %v967_v3  ;;  %v80_v0 = vld [vmem:[%s2225_s0 + $0x210] sm:$0xff] }
  0xd7   :  { %v1129_v7 = vmax.f32 %v1057_v1, %v1093_v4 }
  0xd8   :  { %v646_v8 = vpop.f32.mrf.mxu0  ;;  %v754_v9 = vpop.f32.mrf.mxu1 }
  0xd9   :  { %v1169_v12 = vadd.f32 %v1738_v14, %v1129_v7  ;;  %1372 = vmatmul.msk.f32.gmra.mxu2 %vm162_vm1, %v112_v5  ;;  %1408 = vmatmul.msk.f32.gmra.mxu3 %vm162_vm1, %v148_v6  ;;  %v1058_v15 = vmax.f32 %v646_v8, %v754_v9  ;;  %v117_v7 = vld [vmem:[%s2225_s0 + $0x338] sm:$0xff] }
  0xda   :  { %v153_v8 = vld [vmem:[%s2225_s0 + $0x458] sm:$0xff] }
  0xdb   :  { %v1205_v13 = vmax.f32 %v1169_v12, 0.0  ;;  %1300 = vmatmul.msk.f32.gmra.mxu0 %vm162_vm1, %v40_v10  ;;  %1336 = vmatmul.msk.f32.gmra.mxu1 %vm162_vm1, %v76_v11  ;;  %v45_v12 = vld [vmem:[%s2225_s0 + $0xf8] sm:$0xff] }
  0xdc   :  { %v862_v16 = vpop.f32.mrf.mxu2  ;;  %v970_v17 = vpop.f32.mrf.mxu3 }
  0xdd   :  { %1242 = vst.msk [vmem:[%s2227_s3 + $0x48] sm:$0xff] %vm1232_vm2, %v1205_v13  ;;  %v1094_v18 = vmax.f32 %v862_v16, %v970_v17  ;;  %v81_v13 = vld [vmem:[%s2225_s0 + $0x218] sm:$0xff] }
  0xdf   :  { %v1130_v21 = vmax.f32 %v1058_v15, %v1094_v18 }
  0xe0   :  { %v649_v22 = vpop.f32.mrf.mxu0  ;;  %v757_v23 = vpop.f32.mrf.mxu1 }
  0xe1   :  { %v1170_v26 = vadd.f32 %v1738_v14, %v1130_v21  ;;  %1373 = vmatmul.msk.f32.gmra.mxu2 %vm162_vm1, %v113_v19  ;;  %1409 = vmatmul.msk.f32.gmra.mxu3 %vm162_vm1, %v149_v20  ;;  %v1059_v28 = vmax.f32 %v649_v22, %v757_v23  ;;  %v118_v21 = vld [vmem:[%s2225_s0 + $0x340] sm:$0xff] }
  0xe2   :  { %v154_v22 = vld [vmem:[%s2225_s0 + $0x460] sm:$0xff] }
  0xe3   :  { %v1206_v27 = vmax.f32 %v1170_v26, 0.0  ;;  %1301 = vmatmul.msk.f32.gmra.mxu0 %vm162_vm1, %v41_v24  ;;  %1337 = vmatmul.msk.f32.gmra.mxu1 %vm162_vm1, %v77_v25  ;;  %v46_v26 = vld [vmem:[%s2225_s0 + $0x100] sm:$0xff] }
  0xe4   :  { %v865_v29 = vpop.f32.mrf.mxu2  ;;  %v973_v30 = vpop.f32.mrf.mxu3 }
  0xe5   :  { %1243 = vst.msk [vmem:[%s2227_s3 + $0x50] sm:$0xff] %vm1232_vm2, %v1206_v27  ;;  %v1095_v31 = vmax.f32 %v865_v29, %v973_v30  ;;  %v82_v27 = vld [vmem:[%s2225_s0 + $0x220] sm:$0xff] }
  0xe7   :  { %v1131_v34 = vmax.f32 %v1059_v28, %v1095_v31 }
  0xe8   :  { %v652_v35 = vpop.f32.mrf.mxu0  ;;  %v760_v36 = vpop.f32.mrf.mxu1 }
  0xe9   :  { %v1171_v39 = vadd.f32 %v1738_v14, %v1131_v34  ;;  %1374 = vmatmul.msk.f32.gmra.mxu2 %vm162_vm1, %v114_v32  ;;  %1410 = vmatmul.msk.f32.gmra.mxu3 %vm162_vm1, %v150_v33  ;;  %v1060_v41 = vmax.f32 %v652_v35, %v760_v36  ;;  %v119_v34 = vld [vmem:[%s2225_s0 + $0x348] sm:$0xff] }
  0xea   :  { %v155_v35 = vld [vmem:[%s2225_s0 + $0x468] sm:$0xff] }
  0xeb   :  { %v1207_v40 = vmax.f32 %v1171_v39, 0.0  ;;  %1302 = vmatmul.msk.f32.gmra.mxu0 %vm162_vm1, %v42_v37  ;;  %1338 = vmatmul.msk.f32.gmra.mxu1 %vm162_vm1, %v78_v38  ;;  %v47_v39 = vld [vmem:[%s2225_s0 + $0x108] sm:$0xff] }
  0xec   :  { %v868_v42 = vpop.f32.mrf.mxu2  ;;  %v976_v43 = vpop.f32.mrf.mxu3 }
  0xed   :  { %1244 = vst.msk [vmem:[%s2227_s3 + $0x58] sm:$0xff] %vm1232_vm2, %v1207_v40  ;;  %v1096_v44 = vmax.f32 %v868_v42, %v976_v43  ;;  %v83_v40 = vld [vmem:[%s2225_s0 + $0x228] sm:$0xff] }
  0xef   :  { %v1132_v47 = vmax.f32 %v1060_v41, %v1096_v44 }
  0xf0   :  { %v655_v48 = vpop.f32.mrf.mxu0  ;;  %v763_v49 = vpop.f32.mrf.mxu1 }
  0xf1   :  { %v1172_v52 = vadd.f32 %v1738_v14, %v1132_v47  ;;  %1375 = vmatmul.msk.f32.gmra.mxu2 %vm162_vm1, %v115_v45  ;;  %1411 = vmatmul.msk.f32.gmra.mxu3 %vm162_vm1, %v151_v46  ;;  %v1061_v54 = vmax.f32 %v655_v48, %v763_v49  ;;  %v120_v47 = vld [vmem:[%s2225_s0 + $0x350] sm:$0xff] }
  0xf2   :  { %v156_v48 = vld [vmem:[%s2225_s0 + $0x470] sm:$0xff] }
  0xf3   :  { %v1208_v53 = vmax.f32 %v1172_v52, 0.0  ;;  %1303 = vmatmul.msk.f32.gmra.mxu0 %vm162_vm1, %v43_v50  ;;  %1339 = vmatmul.msk.f32.gmra.mxu1 %vm162_vm1, %v79_v51  ;;  %v48_v52 = vld [vmem:[%s2225_s0 + $0x110] sm:$0xff] }
  0xf4   :  { %v871_v55 = vpop.f32.mrf.mxu2  ;;  %v979_v56 = vpop.f32.mrf.mxu3 }
  0xf5   :  { %1245 = vst.msk [vmem:[%s2227_s3 + $0x60] sm:$0xff] %vm1232_vm2, %v1208_v53  ;;  %v1097_v57 = vmax.f32 %v871_v55, %v979_v56  ;;  %v84_v53 = vld [vmem:[%s2225_s0 + $0x230] sm:$0xff] }
  0xf7   :  { %v1133_v60 = vmax.f32 %v1061_v54, %v1097_v57 }
  0xf8   :  { %v658_v61 = vpop.f32.mrf.mxu0  ;;  %v766_v62 = vpop.f32.mrf.mxu1 }
  0xf9   :  { %v1173_v1 = vadd.f32 %v1738_v14, %v1133_v60  ;;  %1376 = vmatmul.msk.f32.gmra.mxu2 %vm162_vm1, %v116_v58  ;;  %1412 = vmatmul.msk.f32.gmra.mxu3 %vm162_vm1, %v152_v59  ;;  %v1062_v3 = vmax.f32 %v658_v61, %v766_v62  ;;  %v121_v60 = vld [vmem:[%s2225_s0 + $0x358] sm:$0xff] }
  0xfa   :  { %v157_v61 = vld [vmem:[%s2225_s0 + $0x478] sm:$0xff] }
  0xfb   :  { %v1209_v2 = vmax.f32 %v1173_v1, 0.0  ;;  %1304 = vmatmul.msk.f32.gmra.mxu0 %vm162_vm1, %v44_v63  ;;  %1340 = vmatmul.msk.f32.gmra.mxu1 %vm162_vm1, %v80_v0  ;;  %v49_v1 = vld [vmem:[%s2225_s0 + $0x118] sm:$0xff] }
  0xfc   :  { %v874_v4 = vpop.f32.mrf.mxu2  ;;  %v982_v5 = vpop.f32.mrf.mxu3 }
  0xfd   :  { %1246 = vst.msk [vmem:[%s2227_s3 + $0x68] sm:$0xff] %vm1232_vm2, %v1209_v2  ;;  %v1098_v6 = vmax.f32 %v874_v4, %v982_v5  ;;  %v85_v2 = vld [vmem:[%s2225_s0 + $0x238] sm:$0xff] }
  0xff   :  { %v1134_v9 = vmax.f32 %v1062_v3, %v1098_v6 }
 0x100   :  { %v661_v10 = vpop.f32.mrf.mxu0  ;;  %v769_v11 = vpop.f32.mrf.mxu1 }
 0x101   :  { %v1174_v15 = vadd.f32 %v1738_v14, %v1134_v9  ;;  %1377 = vmatmul.msk.f32.gmra.mxu2 %vm162_vm1, %v117_v7  ;;  %1413 = vmatmul.msk.f32.gmra.mxu3 %vm162_vm1, %v153_v8  ;;  %v1063_v17 = vmax.f32 %v661_v10, %v769_v11 }
 0x103   :  { %v1210_v16 = vmax.f32 %v1174_v15, 0.0  ;;  %1305 = vmatmul.msk.f32.gmra.mxu0 %vm162_vm1, %v45_v12  ;;  %1341 = vmatmul.msk.f32.gmra.mxu1 %vm162_vm1, %v81_v13 }
 0x104   :  { %v877_v18 = vpop.f32.mrf.mxu2  ;;  %v985_v19 = vpop.f32.mrf.mxu3 }
 0x105   :  { %1247 = vst.msk [vmem:[%s2227_s3 + $0x70] sm:$0xff] %vm1232_vm2, %v1210_v16  ;;  %v1099_v20 = vmax.f32 %v877_v18, %v985_v19 }
 0x107   :  { %v1135_v23 = vmax.f32 %v1063_v17, %v1099_v20 }
 0x108   :  { %v664_v24 = vpop.f32.mrf.mxu0  ;;  %v772_v25 = vpop.f32.mrf.mxu1 }
 0x109   :  { %v1175_v28 = vadd.f32 %v1738_v14, %v1135_v23  ;;  %1378 = vmatmul.msk.f32.gmra.mxu2 %vm162_vm1, %v118_v21  ;;  %1414 = vmatmul.msk.f32.gmra.mxu3 %vm162_vm1, %v154_v22  ;;  %v1064_v30 = vmax.f32 %v664_v24, %v772_v25 }
 0x10b   :  { %v1211_v29 = vmax.f32 %v1175_v28, 0.0  ;;  %1306 = vmatmul.msk.f32.gmra.mxu0 %vm162_vm1, %v46_v26  ;;  %1342 = vmatmul.msk.f32.gmra.mxu1 %vm162_vm1, %v82_v27 }
 0x10c   :  { %v880_v31 = vpop.f32.mrf.mxu2  ;;  %v988_v32 = vpop.f32.mrf.mxu3 }
 0x10d   :  { %1248 = vst.msk [vmem:[%s2227_s3 + $0x78] sm:$0xff] %vm1232_vm2, %v1211_v29  ;;  %v1100_v33 = vmax.f32 %v880_v31, %v988_v32 }
 0x10f   :  { %v1136_v36 = vmax.f32 %v1064_v30, %v1100_v33 }
 0x110   :  { %v667_v37 = vpop.f32.mrf.mxu0  ;;  %v775_v38 = vpop.f32.mrf.mxu1 }
 0x111   :  { %v1176_v41 = vadd.f32 %v1738_v14, %v1136_v36  ;;  %1379 = vmatmul.msk.f32.gmra.mxu2 %vm162_vm1, %v119_v34  ;;  %1415 = vmatmul.msk.f32.gmra.mxu3 %vm162_vm1, %v155_v35  ;;  %v1065_v43 = vmax.f32 %v667_v37, %v775_v38 }
 0x113   :  { %v1212_v42 = vmax.f32 %v1176_v41, 0.0  ;;  %1307 = vmatmul.msk.f32.gmra.mxu0 %vm162_vm1, %v47_v39  ;;  %1343 = vmatmul.msk.f32.gmra.mxu1 %vm162_vm1, %v83_v40 }
 0x114   :  { %v883_v44 = vpop.f32.mrf.mxu2  ;;  %v991_v45 = vpop.f32.mrf.mxu3 }
 0x115   :  { %1249 = vst.msk [vmem:[%s2227_s3 + $0x80] sm:$0xff] %vm1232_vm2, %v1212_v42  ;;  %v1101_v46 = vmax.f32 %v883_v44, %v991_v45 }
 0x117   :  { %v1137_v49 = vmax.f32 %v1065_v43, %v1101_v46 }
 0x118   :  { %v670_v50 = vpop.f32.mrf.mxu0  ;;  %v778_v51 = vpop.f32.mrf.mxu1 }
 0x119   :  { %v1177_v54 = vadd.f32 %v1738_v14, %v1137_v49  ;;  %1380 = vmatmul.msk.f32.gmra.mxu2 %vm162_vm1, %v120_v47  ;;  %1416 = vmatmul.msk.f32.gmra.mxu3 %vm162_vm1, %v156_v48  ;;  %v1066_v56 = vmax.f32 %v670_v50, %v778_v51 }
 0x11b   :  { %v1213_v55 = vmax.f32 %v1177_v54, 0.0  ;;  %1308 = vmatmul.msk.f32.gmra.mxu0 %vm162_vm1, %v48_v52  ;;  %1344 = vmatmul.msk.f32.gmra.mxu1 %vm162_vm1, %v84_v53 }
 0x11c   :  { %v886_v57 = vpop.f32.mrf.mxu2  ;;  %v994_v58 = vpop.f32.mrf.mxu3 }
 0x11d   :  { %1250 = vst.msk [vmem:[%s2227_s3 + $0x88] sm:$0xff] %vm1232_vm2, %v1213_v55  ;;  %v1102_v59 = vmax.f32 %v886_v57, %v994_v58 }
 0x11f   :  { %v1138_v62 = vmax.f32 %v1066_v56, %v1102_v59 }
 0x120   :  { %v673_v63 = vpop.f32.mrf.mxu0  ;;  %v781_v0 = vpop.f32.mrf.mxu1 }
 0x121   :  { %v1178_v3 = vadd.f32 %v1738_v14, %v1138_v62  ;;  %1381 = vmatmul.msk.f32.gmra.mxu2 %vm162_vm1, %v121_v60  ;;  %1417 = vmatmul.msk.f32.gmra.mxu3 %vm162_vm1, %v157_v61  ;;  %v1067_v5 = vmax.f32 %v673_v63, %v781_v0 }
 0x123   :  { %v1214_v4 = vmax.f32 %v1178_v3, 0.0  ;;  %1309 = vmatmul.msk.f32.gmra.mxu0 %vm162_vm1, %v49_v1  ;;  %1345 = vmatmul.msk.f32.gmra.mxu1 %vm162_vm1, %v85_v2 }
 0x124   :  { %v889_v6 = vpop.f32.mrf.mxu2  ;;  %v997_v7 = vpop.f32.mrf.mxu3 }
 0x125   :  { %1251 = vst.msk [vmem:[%s2227_s3 + $0x90] sm:$0xff] %vm1232_vm2, %v1214_v4  ;;  %v1103_v8 = vmax.f32 %v889_v6, %v997_v7 }
 0x127   :  { %v1139_v9 = vmax.f32 %v1067_v5, %v1103_v8 }
 0x128   :  { %v676_v10 = vpop.f32.mrf.mxu0  ;;  %v784_v11 = vpop.f32.mrf.mxu1 }
 0x129   :  { %v1179_v12 = vadd.f32 %v1738_v14, %v1139_v9  ;;  %v1068_v15 = vmax.f32 %v676_v10, %v784_v11 }
 0x12b   :  { %v1215_v13 = vmax.f32 %v1179_v12, 0.0 }
 0x12c   :  { %v892_v16 = vpop.f32.mrf.mxu2  ;;  %v1000_v17 = vpop.f32.mrf.mxu3 }
 0x12d   :  { %1252 = vst.msk [vmem:[%s2227_s3 + $0x98] sm:$0xff] %vm1232_vm2, %v1215_v13  ;;  %v1104_v18 = vmax.f32 %v892_v16, %v1000_v17 }
 0x12f   :  { %v1140_v19 = vmax.f32 %v1068_v15, %v1104_v18 }
 0x130   :  { %v679_v20 = vpop.f32.mrf.mxu0  ;;  %v787_v21 = vpop.f32.mrf.mxu1 }
 0x131   :  { %v1180_v22 = vadd.f32 %v1738_v14, %v1140_v19  ;;  %v1069_v24 = vmax.f32 %v679_v20, %v787_v21 }
 0x133   :  { %v1216_v23 = vmax.f32 %v1180_v22, 0.0 }
 0x134   :  { %v895_v25 = vpop.f32.mrf.mxu2  ;;  %v1003_v26 = vpop.f32.mrf.mxu3 }
 0x135   :  { %1253 = vst.msk [vmem:[%s2227_s3 + $0xa0] sm:$0xff] %vm1232_vm2, %v1216_v23  ;;  %v1105_v27 = vmax.f32 %v895_v25, %v1003_v26 }
 0x137   :  { %v1141_v28 = vmax.f32 %v1069_v24, %v1105_v27 }
 0x138   :  { %v682_v29 = vpop.f32.mrf.mxu0  ;;  %v790_v30 = vpop.f32.mrf.mxu1 }
 0x139   :  { %v1181_v31 = vadd.f32 %v1738_v14, %v1141_v28  ;;  %v1070_v33 = vmax.f32 %v682_v29, %v790_v30 }
 0x13b   :  { %v1217_v32 = vmax.f32 %v1181_v31, 0.0 }
 0x13c   :  { %v898_v34 = vpop.f32.mrf.mxu2  ;;  %v1006_v35 = vpop.f32.mrf.mxu3 }
 0x13d   :  { %1254 = vst.msk [vmem:[%s2227_s3 + $0xa8] sm:$0xff] %vm1232_vm2, %v1217_v32  ;;  %v1106_v36 = vmax.f32 %v898_v34, %v1006_v35 }
 0x13f   :  { %v1142_v37 = vmax.f32 %v1070_v33, %v1106_v36 }
 0x140   :  { %v685_v38 = vpop.f32.mrf.mxu0  ;;  %v793_v39 = vpop.f32.mrf.mxu1 }
 0x141   :  { %v1182_v40 = vadd.f32 %v1738_v14, %v1142_v37  ;;  %v1071_v42 = vmax.f32 %v685_v38, %v793_v39 }
 0x143   :  { %v1218_v41 = vmax.f32 %v1182_v40, 0.0 }
 0x144   :  { %v901_v43 = vpop.f32.mrf.mxu2  ;;  %v1009_v44 = vpop.f32.mrf.mxu3 }
 0x145   :  { %1255 = vst.msk [vmem:[%s2227_s3 + $0xb0] sm:$0xff] %vm1232_vm2, %v1218_v41  ;;  %v1107_v45 = vmax.f32 %v901_v43, %v1009_v44 }
 0x147   :  { %v1143_v46 = vmax.f32 %v1071_v42, %v1107_v45 }
 0x148   :  { %v688_v47 = vpop.f32.mrf.mxu0  ;;  %v796_v48 = vpop.f32.mrf.mxu1 }
 0x149   :  { %v1183_v49 = vadd.f32 %v1738_v14, %v1143_v46  ;;  %v1072_v51 = vmax.f32 %v688_v47, %v796_v48 }
 0x14b   :  { %v1219_v50 = vmax.f32 %v1183_v49, 0.0 }
 0x14c   :  { %v904_v52 = vpop.f32.mrf.mxu2  ;;  %v1012_v53 = vpop.f32.mrf.mxu3 }
 0x14d   :  { %1256 = vst.msk [vmem:[%s2227_s3 + $0xb8] sm:$0xff] %vm1232_vm2, %v1219_v50  ;;  %v1108_v54 = vmax.f32 %v904_v52, %v1012_v53 }
 0x14f   :  { %v1144_v55 = vmax.f32 %v1072_v51, %v1108_v54 }
 0x150   :  { %v691_v56 = vpop.f32.mrf.mxu0  ;;  %v799_v57 = vpop.f32.mrf.mxu1 }
 0x151   :  { %v1184_v58 = vadd.f32 %v1738_v14, %v1144_v55  ;;  %v1073_v60 = vmax.f32 %v691_v56, %v799_v57 }
 0x153   :  { %v1220_v59 = vmax.f32 %v1184_v58, 0.0 }
 0x154   :  { %v907_v61 = vpop.f32.mrf.mxu2  ;;  %v1015_v62 = vpop.f32.mrf.mxu3 }
 0x155   :  { %1257 = vst.msk [vmem:[%s2227_s3 + $0xc0] sm:$0xff] %vm1232_vm2, %v1220_v59  ;;  %v1109_v63 = vmax.f32 %v907_v61, %v1015_v62 }
 0x157   :  { %v1145_v0 = vmax.f32 %v1073_v60, %v1109_v63 }
 0x158   :  { %v694_v1 = vpop.f32.mrf.mxu0  ;;  %v802_v2 = vpop.f32.mrf.mxu1 }
 0x159   :  { %v1185_v3 = vadd.f32 %v1738_v14, %v1145_v0  ;;  %v1074_v5 = vmax.f32 %v694_v1, %v802_v2 }
 0x15b   :  { %v1221_v4 = vmax.f32 %v1185_v3, 0.0 }
 0x15c   :  { %v910_v6 = vpop.f32.mrf.mxu2  ;;  %v1018_v7 = vpop.f32.mrf.mxu3 }
 0x15d   :  { %1258 = vst.msk [vmem:[%s2227_s3 + $0xc8] sm:$0xff] %vm1232_vm2, %v1221_v4  ;;  %v1110_v8 = vmax.f32 %v910_v6, %v1018_v7 }
 0x15f   :  { %v1146_v9 = vmax.f32 %v1074_v5, %v1110_v8 }
 0x160   :  { %v697_v10 = vpop.f32.mrf.mxu0  ;;  %v805_v11 = vpop.f32.mrf.mxu1 }
 0x161   :  { %v1186_v12 = vadd.f32 %v1738_v14, %v1146_v9  ;;  %v1075_v15 = vmax.f32 %v697_v10, %v805_v11 }
 0x163   :  { %v1222_v13 = vmax.f32 %v1186_v12, 0.0 }
 0x164   :  { %v913_v16 = vpop.f32.mrf.mxu2  ;;  %v1021_v17 = vpop.f32.mrf.mxu3 }
 0x165   :  { %1259 = vst.msk [vmem:[%s2227_s3 + $0xd0] sm:$0xff] %vm1232_vm2, %v1222_v13  ;;  %v1111_v18 = vmax.f32 %v913_v16, %v1021_v17 }
 0x167   :  { %v1147_v19 = vmax.f32 %v1075_v15, %v1111_v18 }
 0x168   :  { %v700_v20 = vpop.f32.mrf.mxu0  ;;  %v808_v21 = vpop.f32.mrf.mxu1 }
 0x169   :  { %v1187_v22 = vadd.f32 %v1738_v14, %v1147_v19  ;;  %v1076_v24 = vmax.f32 %v700_v20, %v808_v21 }
 0x16b   :  { %v1223_v23 = vmax.f32 %v1187_v22, 0.0 }
 0x16c   :  { %v916_v25 = vpop.f32.mrf.mxu2  ;;  %v1024_v26 = vpop.f32.mrf.mxu3 }
 0x16d   :  { %1260 = vst.msk [vmem:[%s2227_s3 + $0xd8] sm:$0xff] %vm1232_vm2, %v1223_v23  ;;  %v1112_v27 = vmax.f32 %v916_v25, %v1024_v26 }
 0x16f   :  { %v1148_v28 = vmax.f32 %v1076_v24, %v1112_v27 }
 0x170   :  { %v703_v29 = vpop.f32.mrf.mxu0  ;;  %v811_v30 = vpop.f32.mrf.mxu1 }
 0x171   :  { %v1188_v31 = vadd.f32 %v1738_v14, %v1148_v28  ;;  %v1077_v33 = vmax.f32 %v703_v29, %v811_v30 }
 0x173   :  { %v1224_v32 = vmax.f32 %v1188_v31, 0.0 }
 0x174   :  { %v919_v34 = vpop.f32.mrf.mxu2  ;;  %v1027_v35 = vpop.f32.mrf.mxu3 }
 0x175   :  { %1261 = vst.msk [vmem:[%s2227_s3 + $0xe0] sm:$0xff] %vm1232_vm2, %v1224_v32  ;;  %v1113_v36 = vmax.f32 %v919_v34, %v1027_v35 }
 0x177   :  { %v1149_v37 = vmax.f32 %v1077_v33, %v1113_v36 }
 0x178   :  { %v706_v38 = vpop.f32.mrf.mxu0  ;;  %v814_v39 = vpop.f32.mrf.mxu1 }
 0x179   :  { %v1189_v40 = vadd.f32 %v1738_v14, %v1149_v37  ;;  %v1078_v42 = vmax.f32 %v706_v38, %v814_v39 }
 0x17b   :  { %v1225_v41 = vmax.f32 %v1189_v40, 0.0 }
 0x17c   :  { %v922_v43 = vpop.f32.mrf.mxu2  ;;  %v1030_v44 = vpop.f32.mrf.mxu3 }
 0x17d   :  { %1262 = vst.msk [vmem:[%s2227_s3 + $0xe8] sm:$0xff] %vm1232_vm2, %v1225_v41  ;;  %v1114_v45 = vmax.f32 %v922_v43, %v1030_v44 }
 0x17f   :  { %v1150_v46 = vmax.f32 %v1078_v42, %v1114_v45 }
 0x180   :  { %v709_v47 = vpop.f32.mrf.mxu0  ;;  %v817_v48 = vpop.f32.mrf.mxu1 }
 0x181   :  { %v1190_v49 = vadd.f32 %v1738_v14, %v1150_v46  ;;  %v1079_v51 = vmax.f32 %v709_v47, %v817_v48 }
 0x183   :  { %v1226_v50 = vmax.f32 %v1190_v49, 0.0 }
 0x184   :  { %v925_v52 = vpop.f32.mrf.mxu2  ;;  %v1033_v53 = vpop.f32.mrf.mxu3 }
 0x185   :  { %1263 = vst.msk [vmem:[%s2227_s3 + $0xf0] sm:$0xff] %vm1232_vm2, %v1226_v50  ;;  %v1115_v54 = vmax.f32 %v925_v52, %v1033_v53 }
 0x187   :  { %v1151_v55 = vmax.f32 %v1079_v51, %v1115_v54 }
 0x188   :  { %v712_v56 = vpop.f32.mrf.mxu0  ;;  %v820_v57 = vpop.f32.mrf.mxu1 }
 0x189   :  { %v1191_v58 = vadd.f32 %v1738_v14, %v1151_v55  ;;  %v1080_v60 = vmax.f32 %v712_v56, %v820_v57 }
 0x18b   :  { %v1227_v59 = vmax.f32 %v1191_v58, 0.0 }
 0x18c   :  { %v928_v61 = vpop.f32.mrf.mxu2  ;;  %v1036_v62 = vpop.f32.mrf.mxu3 }
 0x18d   :  { %1264 = vst.msk [vmem:[%s2227_s3 + $0xf8] sm:$0xff] %vm1232_vm2, %v1227_v59  ;;  %v1116_v63 = vmax.f32 %v928_v61, %v1036_v62 }
 0x18f   :  { %v1152_v0 = vmax.f32 %v1080_v60, %v1116_v63 }
 0x190   :  { %v715_v1 = vpop.f32.mrf.mxu0  ;;  %v823_v2 = vpop.f32.mrf.mxu1 }
 0x191   :  { %v1192_v3 = vadd.f32 %v1738_v14, %v1152_v0  ;;  %v1081_v5 = vmax.f32 %v715_v1, %v823_v2 }
 0x193   :  { %v1228_v4 = vmax.f32 %v1192_v3, 0.0 }
 0x194   :  { %v931_v6 = vpop.f32.mrf.mxu2  ;;  %v1039_v7 = vpop.f32.mrf.mxu3 }
 0x195   :  { %1265 = vst.msk [vmem:[%s2227_s3 + $0x100] sm:$0xff] %vm1232_vm2, %v1228_v4  ;;  %v1117_v8 = vmax.f32 %v931_v6, %v1039_v7 }
 0x197   :  { %v1153_v9 = vmax.f32 %v1081_v5, %v1117_v8 }
 0x198   :  { %v718_v10 = vpop.f32.mrf.mxu0  ;;  %v826_v11 = vpop.f32.mrf.mxu1 }
 0x199   :  { %v1193_v12 = vadd.f32 %v1738_v14, %v1153_v9  ;;  %v1082_v15 = vmax.f32 %v718_v10, %v826_v11 }
 0x19b   :  { %v1229_v13 = vmax.f32 %v1193_v12, 0.0 }
 0x19c   :  { %v934_v16 = vpop.f32.mrf.mxu2  ;;  %v1042_v17 = vpop.f32.mrf.mxu3 }
 0x19d   :  { %1266 = vst.msk [vmem:[%s2227_s3 + $0x108] sm:$0xff] %vm1232_vm2, %v1229_v13  ;;  %v1118_v18 = vmax.f32 %v934_v16, %v1042_v17 }
 0x19f   :  { %v1154_v19 = vmax.f32 %v1082_v15, %v1118_v18 }
 0x1a0   :  { %v721_v20 = vpop.f32.mrf.mxu0  ;;  %v829_v21 = vpop.f32.mrf.mxu1 }
 0x1a1   :  { %v1194_v22 = vadd.f32 %v1738_v14, %v1154_v19  ;;  %v1083_v24 = vmax.f32 %v721_v20, %v829_v21 }
 0x1a3   :  { %v1230_v23 = vmax.f32 %v1194_v22, 0.0 }
 0x1a4   :  { %v937_v25 = vpop.f32.mrf.mxu2  ;;  %v1045_v26 = vpop.f32.mrf.mxu3 }
 0x1a5   :  { %1267 = vst.msk [vmem:[%s2227_s3 + $0x110] sm:$0xff] %vm1232_vm2, %v1230_v23  ;;  %v1119_v27 = vmax.f32 %v937_v25, %v1045_v26 }
 0x1a7   :  { %v1155_v28 = vmax.f32 %v1083_v24, %v1119_v27 }
 0x1a9   :  { %v1195_v29 = vadd.f32 %v1738_v14, %v1155_v28 }
 0x1ab   :  { %v1231_v30 = vmax.f32 %v1195_v29, 0.0 }
 0x1ad   :  { %1268 = vst.msk [vmem:[%s2227_s3 + $0x118] sm:$0xff] %vm1232_vm2, %v1231_v30 }

// kernel: forward.3
= control target key start
LH: loop header
LB: loop body
LE: loop exit
PB: predicated region body
PF: predicated region fallthrough
CT: control target
= control target key end

     0   :  { %s2229_s0 = inlined_call_operand.vmem [shape: f32[128,256], index: 0, kind: input, shape index: {}]   ;;  %s2230_s1 = inlined_call_operand.vmem [shape: f32[256,20], index: 1, kind: input, shape index: {}]   ;;  %s2231_s2 = inlined_call_operand.vmem [shape: f32[1,20], index: 2, kind: input, shape index: {}]   ;;  %s2232_s3 = inlined_call_operand.vmem [shape: f32[20,512], index: 3, kind: input, shape index: {}]   ;;  %s2233_s4 = inlined_call_operand.vmem [shape: f32[32,512], index: 4, kind: input, shape index: {}]   ;;  %s2234_s5 = inlined_call_operand.vmem [shape: f32[512,32], index: 5, kind: input, shape index: {}]   ;;  %s2235_s6 = inlined_call_operand.vmem [shape: f32[2,32], index: 6, kind: input, shape index: {}]   ;;  %s2236_s7 = inlined_call_operand.vmem [shape: f32[1,32], index: 7, kind: input, shape index: {}]   ;;  %s2237_s8 = inlined_call_operand.vmem [shape: f32[32,4], index: 8, kind: input, shape index: {}]   ;;  %s2238_s9 = inlined_call_operand.vmem [shape: f32[32,4], index: 9, kind: input, shape index: {}]   ;;  %s2239_s10 = inlined_call_operand.vmem [shape: f32[1,4], index: 10, kind: input, shape index: {}]   ;;  %s2240_s11 = inlined_call_operand.vmem [shape: f32[32,128], index: 11, kind: input, shape index: {}]   ;;  %s2241_s12 = inlined_call_operand.vmem [shape: f32[1,128], index: 12, kind: input, shape index: {}]   ;;  %s2242_s13 = inlined_call_operand.vmem [shape: f32[4,128], index: 13, kind: input, shape index: {}]   ;;  %s2243_s14 = inlined_call_operand.vmem [shape: f32[128,32], index: 14, kind: input, shape index: {}]   ;;  %s2244_s15 = inlined_call_operand.vmem [shape: f32[32,10], index: 15, kind: input, shape index: {}]   ;;  %s2245_s16 = inlined_call_operand.vmem [shape: f32[1,10], index: 16, kind: input, shape index: {}]   ;;  %s2246_s17 = inlined_call_operand.hbm [shape: f32[2,32], index: 17, kind: output, shape index: {0}]   ;;  %s2247_s18 = inlined_call_operand.hbm [shape: f32[2,10], index: 18, kind: output, shape index: {1}]  }
   0x1   :  { %2250 = sst [smem:[#allocation8_spill]] %s2229_s0 }
   0x2   :  { %2251 = sst [smem:[#allocation9_spill]] %s2230_s1 }
   0x3   :  { %2252 = sst [smem:[#allocation10_spill]] %s2231_s2 }
   0x4   :  { %24 = vsyncpa [#allocation3], 0  ;;  %s2253_s29 = sld [smem:[#allocation9_spill]] }
   0xa   :  { %v107_v0 = vld [vmem:[%s2253_s29 + $0x78] sm:$0xff]  ;;  %v106_v2 = vld [vmem:[%s2253_s29 + $0x70] sm:$0xff]  ;;  %v105_v4 = vld [vmem:[%s2253_s29 + $0x68] sm:$0xff] }
   0xb   :  { %v123_v1 = vld [vmem:[%s2253_s29 + $0xf8] sm:$0xff]  ;;  %124 = vmatpush.msra.mxu0 %v107_v0  ;;  %v122_v3 = vld [vmem:[%s2253_s29 + $0xf0] sm:$0xff]  ;;  %v121_v5 = vld [vmem:[%s2253_s29 + $0xe8] sm:$0xff] }
   0xc   :  { %189 = vmatpush.msra.mxu1 %v123_v1  ;;  %v104_v6 = vld [vmem:[%s2253_s29 + $0x60] sm:$0xff]  ;;  %v103_v8 = vld [vmem:[%s2253_s29 + $0x58] sm:$0xff]  ;;  %v102_v10 = vld [vmem:[%s2253_s29 + $0x50] sm:$0xff] }
   0xd   :  { %125 = vmatpush.msra.mxu0 %v106_v2  ;;  %v120_v7 = vld [vmem:[%s2253_s29 + $0xe0] sm:$0xff]  ;;  %v119_v9 = vld [vmem:[%s2253_s29 + $0xd8] sm:$0xff]  ;;  %v118_v11 = vld [vmem:[%s2253_s29 + $0xd0] sm:$0xff] }
   0xe   :  { %190 = vmatpush.msra.mxu1 %v122_v3  ;;  %v101_v12 = vld [vmem:[%s2253_s29 + $0x48] sm:$0xff]  ;;  %v100_v14 = vld [vmem:[%s2253_s29 + $0x40] sm:$0xff]  ;;  %v99_v16 = vld [vmem:[%s2253_s29 + $0x38] sm:$0xff] }
   0xf   :  { %126 = vmatpush.msra.mxu0 %v105_v4  ;;  %v117_v13 = vld [vmem:[%s2253_s29 + $0xc8] sm:$0xff]  ;;  %v116_v15 = vld [vmem:[%s2253_s29 + $0xc0] sm:$0xff]  ;;  %v115_v17 = vld [vmem:[%s2253_s29 + $0xb8] sm:$0xff] }
  0x10   :  { %191 = vmatpush.msra.mxu1 %v121_v5 }
  0x11   :  { %127 = vmatpush.msra.mxu0 %v104_v6 }
  0x12   :  { %192 = vmatpush.msra.mxu1 %v120_v7 }
  0x13   :  { %128 = vmatpush.msra.mxu0 %v103_v8 }
  0x14   :  { %193 = vmatpush.msra.mxu1 %v119_v9 }
  0x15   :  { %129 = vmatpush.msra.mxu0 %v102_v10 }
  0x16   :  { %194 = vmatpush.msra.mxu1 %v118_v11 }
  0x17   :  { %130 = vmatpush.msra.mxu0 %v101_v12 }
  0x18   :  { %195 = vmatpush.msra.mxu1 %v117_v13 }
  0x19   :  { %25 = vsyncpa [#allocation5], 0  ;;  %131 = vmatpush.msra.mxu0 %v100_v14  ;;  %v98_v18 = vld [vmem:[%s2253_s29 + $0x30] sm:$0xff]  ;;  %v97_v20 = vld [vmem:[%s2253_s29 + $0x28] sm:$0xff]  ;;  %s2254_s23 = sld [smem:[#allocation8_spill]]  ;;  %vm303_vm0 = vcmask 1043456  }
  0x1a   :  { %196 = vmatpush.msra.mxu1 %v116_v15  ;;  %v114_v19 = vld [vmem:[%s2253_s29 + $0xb0] sm:$0xff]  ;;  %v113_v21 = vld [vmem:[%s2253_s29 + $0xa8] sm:$0xff]  ;;  %v96_v22 = vld [vmem:[%s2253_s29 + $0x20] sm:$0xff]  ;;  %vm290_vm1 = vcmask 162816   ;;  %vm649_vm2 = vcmask 261120   ;;  %vm674_vm3 = vcmask 254976  }
  0x1b   :  { %132 = vmatpush.msra.mxu0 %v99_v16  ;;  %v112_v23 = vld [vmem:[%s2253_s29 + $0xa0] sm:$0xff]  ;;  %v95_v24 = vld [vmem:[%s2253_s29 + $0x18] sm:$0xff]  ;;  %v94_v26 = vld [vmem:[%s2253_s29 + $0x10] sm:$0xff]  ;;  %vm758_vm4 = vcmask 25600   ;;  %vm810_vm5 = vcmask 31744  }
  0x1c   :  { %197 = vmatpush.msra.mxu1 %v115_v17  ;;  %v111_v25 = vld [vmem:[%s2253_s29 + $0x98] sm:$0xff]  ;;  %v110_v27 = vld [vmem:[%s2253_s29 + $0x90] sm:$0xff]  ;;  %v93_v28 = vld [vmem:[%s2253_s29 + $0x8] sm:$0xff] }
  0x1d   :  { %133 = vmatpush.msra.mxu0 %v98_v18  ;;  %v109_v29 = vld [vmem:[%s2253_s29 + $0x88] sm:$0xff]  ;;  %v92_v30 = vld [vmem:[%s2253_s29] sm:$0xff] }
  0x1e   :  { %198 = vmatpush.msra.mxu1 %v114_v19  ;;  %v108_v31 = vld [vmem:[%s2253_s29 + $0x80] sm:$0xff]  ;;  %s2255_s29 = sld [smem:[#allocation10_spill]] }
  0x1f   :  { %134 = vmatpush.msra.mxu0 %v97_v20  ;;  %v60_v32 = vld [vmem:[%s2254_s23] sm:$0xff]  ;;  %v61_v33 = vld [vmem:[%s2254_s23 + $0x8] sm:$0xff]  ;;  %v62_v34 = vld [vmem:[%s2254_s23 + $0x10] sm:$0xff] }
  0x20   :  { %199 = vmatpush.msra.mxu1 %v113_v21  ;;  %v63_v35 = vld [vmem:[%s2254_s23 + $0x18] sm:$0xff]  ;;  %v64_v36 = vld [vmem:[%s2254_s23 + $0x20] sm:$0xff]  ;;  %v65_v37 = vld [vmem:[%s2254_s23 + $0x28] sm:$0xff] }
  0x21   :  { %135 = vmatpush.msra.mxu0 %v96_v22  ;;  %v66_v38 = vld [vmem:[%s2254_s23 + $0x30] sm:$0xff]  ;;  %v67_v39 = vld [vmem:[%s2254_s23 + $0x38] sm:$0xff]  ;;  %v68_v40 = vld [vmem:[%s2254_s23 + $0x40] sm:$0xff] }
  0x22   :  { %200 = vmatpush.msra.mxu1 %v112_v23  ;;  %v69_v41 = vld [vmem:[%s2254_s23 + $0x48] sm:$0xff]  ;;  %v70_v42 = vld [vmem:[%s2254_s23 + $0x50] sm:$0xff]  ;;  %v71_v43 = vld [vmem:[%s2254_s23 + $0x58] sm:$0xff] }
  0x23   :  { %136 = vmatpush.msra.mxu0 %v95_v24  ;;  %v72_v44 = vld [vmem:[%s2254_s23 + $0x60] sm:$0xff]  ;;  %v73_v45 = vld [vmem:[%s2254_s23 + $0x68] sm:$0xff]  ;;  %v74_v46 = vld [vmem:[%s2254_s23 + $0x70] sm:$0xff] }
  0x24   :  { %201 = vmatpush.msra.mxu1 %v111_v25  ;;  %v75_v47 = vld [vmem:[%s2254_s23 + $0x78] sm:$0xff]  ;;  %v76_v48 = vld [vmem:[%s2254_s23 + $0x80] sm:$0xff]  ;;  %v77_v49 = vld [vmem:[%s2254_s23 + $0x88] sm:$0xff] }
  0x25   :  { %137 = vmatpush.msra.mxu0 %v94_v26  ;;  %v78_v50 = vld [vmem:[%s2254_s23 + $0x90] sm:$0xff]  ;;  %v79_v51 = vld [vmem:[%s2254_s23 + $0x98] sm:$0xff]  ;;  %v80_v52 = vld [vmem:[%s2254_s23 + $0xa0] sm:$0xff] }
  0x26   :  { %202 = vmatpush.msra.mxu1 %v110_v27  ;;  %v81_v53 = vld [vmem:[%s2254_s23 + $0xa8] sm:$0xff]  ;;  %v82_v54 = vld [vmem:[%s2254_s23 + $0xb0] sm:$0xff]  ;;  %v83_v55 = vld [vmem:[%s2254_s23 + $0xb8] sm:$0xff] }
  0x27   :  { %138 = vmatpush.msra.mxu0 %v93_v28  ;;  %v84_v56 = vld [vmem:[%s2254_s23 + $0xc0] sm:$0xff]  ;;  %v85_v57 = vld [vmem:[%s2254_s23 + $0xc8] sm:$0xff]  ;;  %v86_v58 = vld [vmem:[%s2254_s23 + $0xd0] sm:$0xff] }
  0x28   :  { %203 = vmatpush.msra.mxu1 %v109_v29  ;;  %v87_v59 = vld [vmem:[%s2254_s23 + $0xd8] sm:$0xff]  ;;  %v88_v60 = vld [vmem:[%s2254_s23 + $0xe0] sm:$0xff]  ;;  %v89_v61 = vld [vmem:[%s2254_s23 + $0xe8] sm:$0xff] }
  0x29   :  { %139 = vmatpush.msra.mxu0 %v92_v30  ;;  %v90_v62 = vld [vmem:[%s2254_s23 + $0xf0] sm:$0xff]  ;;  %v91_v63 = vld [vmem:[%s2254_s23 + $0xf8] sm:$0xff]  ;;  %v286_v30 = vld [vmem:[%s2232_s3 + $0x40] sm:$0xf] }
  0x2a   :  { %204 = vmatpush.msra.mxu1 %v108_v31  ;;  %140 = vmatmul.f32.vlgmr.msra.gmra.mxu0 %v60_v32  ;;  %v287_v31 = vld [vmem:[%s2232_s3 + $0x48] sm:$0xf]  ;;  %v282_v32 = vld [vmem:[%s2232_s3 + $0x20] sm:$0xff] }
  0x2b   :  { %205 = vmatmul.f32.vlgmr.msra.gmra.mxu1 %v61_v33  ;;  %1260 = vmatpush.msk.msra.mxu2 %vm303_vm0, %v286_v30  ;;  %v283_v33 = vld [vmem:[%s2232_s3 + $0x28] sm:$0xff] }
  0x2c   :  { %1265 = vmatpush.msk.msra.mxu3 %vm303_vm0, %v287_v31  ;;  %v489_v30 = vld [vmem:[%s2234_s5 + $0xc8] sm:$0xff]  ;;  %v472_v31 = vld [vmem:[%s2234_s5 + $0x40] sm:$0xff] }
  0x2d   :  { %330 = vmatpush.msra.mxu2 %v282_v32  ;;  %v488_v32 = vld [vmem:[%s2234_s5 + $0xc0] sm:$0xff] }
  0x2e   :  { %359 = vmatpush.msra.mxu3 %v283_v33  ;;  %v471_v33 = vld [vmem:[%s2234_s5 + $0x38] sm:$0xff] }
  0x32   :  { %143 = vmatmul.f32.gmra.mxu0 %v62_v34 }
  0x33   :  { %208 = vmatmul.f32.gmra.mxu1 %v63_v35 }
  0x3a   :  { %146 = vmatmul.f32.gmra.mxu0 %v64_v36  ;;  %v278_v36 = vld [vmem:[%s2232_s3] sm:$0xff] }
  0x3b   :  { %211 = vmatmul.f32.gmra.mxu1 %v65_v37  ;;  %v279_v37 = vld [vmem:[%s2232_s3 + $0x8] sm:$0xff]  ;;  %331 = vmatpush.msra.mxu2 %v278_v36  ;;  %v486_v36 = vld [vmem:[%s2234_s5 + $0xb0] sm:$0xff] }
  0x3c   :  { %360 = vmatpush.msra.mxu3 %v279_v37  ;;  %v469_v37 = vld [vmem:[%s2234_s5 + $0x28] sm:$0xff] }
  0x42   :  { %149 = vmatmul.f32.gmra.mxu0 %v66_v38 }
  0x43   :  { %214 = vmatmul.f32.gmra.mxu1 %v67_v39 }
  0x4a   :  { %152 = vmatmul.f32.gmra.mxu0 %v68_v40 }
  0x4b   :  { %217 = vmatmul.f32.gmra.mxu1 %v69_v41 }
  0x52   :  { %155 = vmatmul.f32.gmra.mxu0 %v70_v42 }
  0x53   :  { %220 = vmatmul.f32.gmra.mxu1 %v71_v43 }
  0x5a   :  { %158 = vmatmul.f32.gmra.mxu0 %v72_v44 }
  0x5b   :  { %223 = vmatmul.f32.gmra.mxu1 %v73_v45 }
  0x62   :  { %161 = vmatmul.f32.gmra.mxu0 %v74_v46  ;;  %v1302_v46 = vld [vmem:[%s2255_s29] ss:$0 sm:$0xff]  ;;  %s1235_s29 = sshll.u32 %s2246_s17, 4  ;;  %s1236_s29 = int_to_ptr.hbm [resolvable:$true] %s1235_s29 }
  0x63   :  { %226 = vmatmul.f32.gmra.mxu1 %v75_v47 }
  0x6a   :  { %164 = vmatmul.f32.gmra.mxu0 %v76_v48  ;;  %v288_v48 = vld [vmem:[%s2232_s3 + $0x50] sm:$0xf] }
  0x6b   :  { %229 = vmatmul.f32.gmra.mxu1 %v77_v49  ;;  %v289_v49 = vld [vmem:[%s2232_s3 + $0x58] sm:$0xf]  ;;  %1270 = vmatpush.msk.msrb.mxu2 %vm303_vm0, %v288_v48  ;;  %v480_v48 = vld [vmem:[%s2234_s5 + $0x80] sm:$0xff] }
  0x6c   :  { %1275 = vmatpush.msk.msrb.mxu3 %vm303_vm0, %v289_v49  ;;  %v511_v49 = vld [vmem:[%s2234_s5 + $0x178] sm:$0xff] }
  0x72   :  { %167 = vmatmul.f32.gmra.mxu0 %v78_v50  ;;  %v284_v50 = vld [vmem:[%s2232_s3 + $0x30] sm:$0xff] }
  0x73   :  { %232 = vmatmul.f32.gmra.mxu1 %v79_v51  ;;  %v285_v51 = vld [vmem:[%s2232_s3 + $0x38] sm:$0xff]  ;;  %388 = vmatpush.msrb.mxu2 %v284_v50 }
  0x74   :  { %417 = vmatpush.msrb.mxu3 %v285_v51  ;;  %v527_v50 = vld [vmem:[%s2234_s5 + $0x1f8] sm:$0xff]  ;;  %v510_v51 = vld [vmem:[%s2234_s5 + $0x170] sm:$0xff] }
  0x7a   :  { %170 = vmatmul.f32.gmra.mxu0 %v80_v52 }
  0x7b   :  { %235 = vmatmul.f32.gmra.mxu1 %v81_v53  ;;  %v280_v53 = vld [vmem:[%s2232_s3 + $0x10] sm:$0xff] }
  0x7c   :  { %389 = vmatpush.msrb.mxu2 %v280_v53  ;;  %v509_v53 = vld [vmem:[%s2234_s5 + $0x168] sm:$0xff] }
  0x82   :  { %173 = vmatmul.f32.gmra.mxu0 %v82_v54  ;;  %v281_v54 = vld [vmem:[%s2232_s3 + $0x18] sm:$0xff]  ;;  %s1387_s3 = smov [#allocation2]  }
  0x83   :  { %238 = vmatmul.f32.gmra.mxu1 %v83_v55  ;;  %418 = vmatpush.msrb.mxu3 %v281_v54  ;;  %v525_v54 = vld [vmem:[%s2234_s5 + $0x1e8] sm:$0xff] }
  0x8a   :  { %176 = vmatmul.f32.gmra.mxu0 %v84_v56 }
  0x8b   :  { %241 = vmatmul.f32.gmra.mxu1 %v85_v57 }
  0x92   :  { %179 = vmatmul.f32.gmra.mxu0 %v86_v58 }
  0x93   :  { %244 = vmatmul.f32.gmra.mxu1 %v87_v59 }
  0x9a   :  { %182 = vmatmul.f32.gmra.mxu0 %v88_v60 }
  0x9b   :  { %247 = vmatmul.f32.gmra.mxu1 %v89_v61 }
  0xa2   :  { %185 = vmatmul.f32.gmra.mxu0 %v90_v62 }
  0xa3   :  { %250 = vmatmul.f32.gmra.mxu1 %v91_v63 }
  0xa7   :  { %v141_v0 = vpop.f32.mrf.mxu0 }
  0xa8   :  { %v206_v1 = vpop.f32.mrf.mxu1 }
  0xa9   :  { %v207_v2 = vadd.f32 %v206_v1, %v141_v0 }
  0xaf   :  { %v144_v3 = vpop.f32.mrf.mxu0 }
  0xb0   :  { %v209_v4 = vpop.f32.mrf.mxu1 }
  0xb1   :  { %v1676_v5 = vadd.f32 %v209_v4, %v144_v3 }
  0xb7   :  { %v147_v6 = vpop.f32.mrf.mxu0 }
  0xb8   :  { %v212_v7 = vpop.f32.mrf.mxu1 }
  0xb9   :  { %v1678_v8 = vadd.f32 %v212_v7, %v147_v6 }
  0xbf   :  { %v150_v9 = vpop.f32.mrf.mxu0 }
  0xc0   :  { %v215_v10 = vpop.f32.mrf.mxu1 }
  0xc1   :  { %v1680_v11 = vadd.f32 %v215_v10, %v150_v9 }
  0xc7   :  { %v153_v12 = vpop.f32.mrf.mxu0 }
  0xc8   :  { %v218_v13 = vpop.f32.mrf.mxu1 }
  0xc9   :  { %v219_v14 = vadd.f32 %v218_v13, %v153_v12 }
  0xcb   :  { %v254_v15 = vmax.f32 %v207_v2, %v219_v14 }
  0xcf   :  { %v156_v16 = vpop.f32.mrf.mxu0 }
  0xd0   :  { %v221_v17 = vpop.f32.mrf.mxu1 }
  0xd1   :  { %v222_v18 = vadd.f32 %v221_v17, %v156_v16 }
  0xd3   :  { %v255_v19 = vmax.f32 %v1676_v5, %v222_v18  ;;  %v479_v18 = vld [vmem:[%s2234_s5 + $0x78] sm:$0xff] }
  0xd7   :  { %v159_v20 = vpop.f32.mrf.mxu0 }
  0xd8   :  { %v224_v21 = vpop.f32.mrf.mxu1 }
  0xd9   :  { %v1683_v22 = vadd.f32 %v224_v21, %v159_v20  ;;  %v494_v20 = vld [vmem:[%s2234_s5 + $0xf0] sm:$0xff]  ;;  %v477_v21 = vld [vmem:[%s2234_s5 + $0x68] sm:$0xff] }
  0xdb   :  { %v256_v23 = vmax.f32 %v1678_v8, %v1683_v22  ;;  %v493_v22 = vld [vmem:[%s2234_s5 + $0xe8] sm:$0xff] }
  0xdf   :  { %v162_v24 = vpop.f32.mrf.mxu0 }
  0xe0   :  { %v227_v25 = vpop.f32.mrf.mxu1 }
  0xe1   :  { %v1687_v26 = vadd.f32 %v227_v25, %v162_v24  ;;  %v492_v24 = vld [vmem:[%s2234_s5 + $0xe0] sm:$0xff]  ;;  %v475_v25 = vld [vmem:[%s2234_s5 + $0x58] sm:$0xff] }
  0xe3   :  { %v257_v27 = vmax.f32 %v1680_v11, %v1687_v26  ;;  %v478_v11 = vld [vmem:[%s2234_s5 + $0x70] sm:$0xff]  ;;  %v491_v26 = vld [vmem:[%s2234_s5 + $0xd8] sm:$0xff] }
  0xe7   :  { %v165_v28 = vpop.f32.mrf.mxu0 }
  0xe8   :  { %v230_v29 = vpop.f32.mrf.mxu1 }
  0xe9   :  { %v231_v44 = vadd.f32 %v230_v29, %v165_v28  ;;  %v490_v28 = vld [vmem:[%s2234_s5 + $0xd0] sm:$0xff]  ;;  %v473_v29 = vld [vmem:[%s2234_s5 + $0x48] sm:$0xff] }
  0xef   :  { %v168_v34 = vpop.f32.mrf.mxu0 }
  0xf0   :  { %v233_v35 = vpop.f32.mrf.mxu1 }
  0xf1   :  { %v234_v58 = vadd.f32 %v233_v35, %v168_v34  ;;  %v487_v34 = vld [vmem:[%s2234_s5 + $0xb8] sm:$0xff]  ;;  %v470_v35 = vld [vmem:[%s2234_s5 + $0x30] sm:$0xff] }
  0xf7   :  { %v171_v38 = vpop.f32.mrf.mxu0 }
  0xf8   :  { %v236_v39 = vpop.f32.mrf.mxu1 }
  0xf9   :  { %v237_v2 = vadd.f32 %v236_v39, %v171_v38  ;;  %v485_v38 = vld [vmem:[%s2234_s5 + $0xa8] sm:$0xff]  ;;  %v468_v39 = vld [vmem:[%s2234_s5 + $0x20] sm:$0xff] }
  0xff   :  { %v174_v40 = vpop.f32.mrf.mxu0 }
 0x100   :  { %v239_v41 = vpop.f32.mrf.mxu1 }
 0x101   :  { %v240_v12 = vadd.f32 %v239_v41, %v174_v40  ;;  %v484_v40 = vld [vmem:[%s2234_s5 + $0xa0] sm:$0xff]  ;;  %v467_v41 = vld [vmem:[%s2234_s5 + $0x18] sm:$0xff] }
 0x107   :  { %v177_v42 = vpop.f32.mrf.mxu0 }
 0x108   :  { %v242_v43 = vpop.f32.mrf.mxu1 }
 0x109   :  { %v243_v45 = vadd.f32 %v242_v43, %v177_v42  ;;  %v483_v42 = vld [vmem:[%s2234_s5 + $0x98] sm:$0xff]  ;;  %v466_v43 = vld [vmem:[%s2234_s5 + $0x10] sm:$0xff] }
 0x10b   :  { %v258_v47 = vmax.f32 %v231_v44, %v243_v45  ;;  %v482_v44 = vld [vmem:[%s2234_s5 + $0x90] sm:$0xff]  ;;  %v465_v45 = vld [vmem:[%s2234_s5 + $0x8] sm:$0xff] }
 0x10d   :  { %v262_v52 = vmax.f32 %v254_v15, %v258_v47  ;;  %v464_v47 = vld [vmem:[%s2234_s5] sm:$0xff] }
 0x10f   :  { %v270_v55 = vadd.f32 %v1302_v46, %v262_v52  ;;  %v180_v56 = vpop.f32.mrf.mxu0  ;;  %v526_v52 = vld [vmem:[%s2234_s5 + $0x1f0] sm:$0xff] }
 0x110   :  { %v245_v57 = vpop.f32.mrf.mxu1 }
 0x111   :  { %v274_v59 = vmax.f32 %v270_v55, 0.0  ;;  %v246_v60 = vadd.f32 %v245_v57, %v180_v56  ;;  %v508_v55 = vld [vmem:[%s2234_s5 + $0x160] sm:$0xff]  ;;  %v507_v57 = vld [vmem:[%s2234_s5 + $0x158] sm:$0xff] }
 0x112   :  { %v524_v56 = vld [vmem:[%s2234_s5 + $0x1e0] sm:$0xff] }
 0x113   :  { %v259_v61 = vmax.f32 %v234_v58, %v246_v60  ;;  %1261 = vmatmul.msk.f32.vlgmr.msra.gmra.mxu2 %vm290_vm1, %v274_v59  ;;  %1266 = vmatmul.msk.f32.vlgmr.msra.gmra.mxu3 %vm290_vm1, %v274_v59  ;;  %v523_v58 = vld [vmem:[%s2234_s5 + $0x1d8] sm:$0xff]  ;;  %v522_v60 = vld [vmem:[%s2234_s5 + $0x1d0] sm:$0xff] }
 0x114   :  { %528 = vmatpush.msra.mxu2 %v479_v18 }
 0x115   :  { %v263_v62 = vmax.f32 %v255_v19, %v259_v61  ;;  %v495_v19 = vld [vmem:[%s2234_s5 + $0xf8] sm:$0xff]  ;;  %v505_v61 = vld [vmem:[%s2234_s5 + $0x148] sm:$0xff] }
 0x116   :  { %557 = vmatpush.msra.mxu3 %v495_v19  ;;  %529 = vmatpush.msra.mxu2 %v478_v11 }
 0x117   :  { %v271_v63 = vadd.f32 %v1302_v46, %v263_v62  ;;  %v183_v0 = vpop.f32.mrf.mxu0  ;;  %v521_v62 = vld [vmem:[%s2234_s5 + $0x1c8] sm:$0xff] }
 0x118   :  { %v248_v1 = vpop.f32.mrf.mxu1  ;;  %558 = vmatpush.msra.mxu3 %v494_v20  ;;  %530 = vmatpush.msra.mxu2 %v477_v21  ;;  %v496_v21 = vld [vmem:[%s2234_s5 + $0x100] sm:$0xff] }
 0x119   :  { %v275_v3 = vmax.f32 %v271_v63, 0.0  ;;  %v249_v4 = vadd.f32 %v248_v1, %v183_v0  ;;  %v504_v63 = vld [vmem:[%s2234_s5 + $0x140] sm:$0xff]  ;;  %v503_v1 = vld [vmem:[%s2234_s5 + $0x138] sm:$0xff] }
 0x11a   :  { %559 = vmatpush.msra.mxu3 %v493_v22  ;;  %v520_v0 = vld [vmem:[%s2234_s5 + $0x1c0] sm:$0xff] }
 0x11b   :  { %v260_v5 = vmax.f32 %v237_v2, %v249_v4  ;;  %1262 = vmatmul.msk.f32.gmra.mxu2 %vm290_vm1, %v275_v3  ;;  %1267 = vmatmul.msk.f32.gmra.mxu3 %vm290_vm1, %v275_v3  ;;  %v519_v2 = vld [vmem:[%s2234_s5 + $0x1b8] sm:$0xff]  ;;  %v518_v4 = vld [vmem:[%s2234_s5 + $0x1b0] sm:$0xff]  ;;  %v512_v22 = vld [vmem:[%s2234_s5 + $0x180] sm:$0xff] }
 0x11c   :  { %560 = vmatpush.msra.mxu3 %v492_v24  ;;  %v437_v24 = vld [vmem:[%s2233_s4 + $0x28] sm:$0xff] }
 0x11d   :  { %v264_v6 = vmax.f32 %v256_v23, %v260_v5  ;;  %v476_v23 = vld [vmem:[%s2234_s5 + $0x60] sm:$0xff]  ;;  %v501_v5 = vld [vmem:[%s2234_s5 + $0x128] sm:$0xff] }
 0x11e   :  { %531 = vmatpush.msra.mxu2 %v476_v23  ;;  %561 = vmatpush.msra.mxu3 %v491_v26  ;;  %v436_v23 = vld [vmem:[%s2233_s4 + $0x20] sm:$0xff] }
 0x11f   :  { %v272_v7 = vadd.f32 %v1302_v46, %v264_v6  ;;  %v186_v9 = vpop.f32.mrf.mxu0  ;;  %v517_v6 = vld [vmem:[%s2234_s5 + $0x1a8] sm:$0xff] }
 0x120   :  { %v251_v10 = vpop.f32.mrf.mxu1  ;;  %532 = vmatpush.msra.mxu2 %v475_v25  ;;  %562 = vmatpush.msra.mxu3 %v490_v28 }
 0x121   :  { %v1741_v13 = vmax.f32 %v272_v7, 0.0  ;;  %v252_v14 = vadd.f32 %v251_v10, %v186_v9  ;;  %v500_v7 = vld [vmem:[%s2234_s5 + $0x120] sm:$0xff]  ;;  %v499_v10 = vld [vmem:[%s2234_s5 + $0x118] sm:$0xff] }
 0x122   :  { %563 = vmatpush.msra.mxu3 %v489_v30  ;;  %v516_v9 = vld [vmem:[%s2234_s5 + $0x1a0] sm:$0xff]  ;;  %v441_v30 = vld [vmem:[%s2233_s4 + $0x48] sm:$0xff] }
 0x123   :  { %v261_v15 = vmax.f32 %v240_v12, %v252_v14  ;;  %1263 = vmatmul.msk.f32.gmra.mxu2 %vm290_vm1, %v1741_v13  ;;  %1268 = vmatmul.msk.f32.gmra.mxu3 %vm290_vm1, %v1741_v13  ;;  %v515_v12 = vld [vmem:[%s2234_s5 + $0x198] sm:$0xff]  ;;  %v514_v14 = vld [vmem:[%s2234_s5 + $0x190] sm:$0xff] }
 0x124   :  { %564 = vmatpush.msra.mxu3 %v488_v32 }
 0x125   :  { %v265_v16 = vmax.f32 %v257_v27, %v261_v15  ;;  %v474_v27 = vld [vmem:[%s2234_s5 + $0x50] sm:$0xff]  ;;  %v432_v15 = vld [vmem:[%s2233_s4] sm:$0xff] }
 0x126   :  { %533 = vmatpush.msra.mxu2 %v474_v27  ;;  %565 = vmatpush.msra.mxu3 %v487_v34 }
 0x127   :  { %v273_v8 = vadd.f32 %v1302_v46, %v265_v16  ;;  %v481_v46 = vld [vmem:[%s2234_s5 + $0x88] sm:$0xff] }
 0x128   :  { %534 = vmatpush.msra.mxu2 %v473_v29  ;;  %566 = vmatpush.msra.mxu3 %v486_v36  ;;  %v433_v16 = vld [vmem:[%s2233_s4 + $0x8] sm:$0xff]  ;;  %v440_v29 = vld [vmem:[%s2233_s4 + $0x40] sm:$0xff] }
 0x129   :  { %v1750_v17 = vmax.f32 %v273_v8, 0.0  ;;  %v497_v8 = vld [vmem:[%s2234_s5 + $0x108] sm:$0xff] }
 0x12a   :  { %535 = vmatpush.msra.mxu2 %v472_v31  ;;  %567 = vmatpush.msra.mxu3 %v485_v38  ;;  %v445_v36 = vld [vmem:[%s2233_s4 + $0x68] sm:$0xff] }
 0x12b   :  { %1264 = vmatmul.msk.f32.gmra.mxu2 %vm290_vm1, %v1750_v17  ;;  %1269 = vmatmul.msk.f32.gmra.mxu3 %vm290_vm1, %v1750_v17 }
 0x12c   :  { %536 = vmatpush.msra.mxu2 %v471_v33  ;;  %568 = vmatpush.msra.mxu3 %v484_v40 }
 0x12e   :  { %537 = vmatpush.msra.mxu2 %v470_v35  ;;  %569 = vmatpush.msra.mxu3 %v483_v42  ;;  %v444_v35 = vld [vmem:[%s2233_s4 + $0x60] sm:$0xff]  ;;  %v435_v42 = vld [vmem:[%s2233_s4 + $0x18] sm:$0xff] }
 0x130   :  { %538 = vmatpush.msra.mxu2 %v469_v37  ;;  %570 = vmatpush.msra.mxu3 %v482_v44 }
 0x132   :  { %539 = vmatpush.msra.mxu2 %v468_v39  ;;  %571 = vmatpush.msra.mxu3 %v481_v46 }
 0x133   :  { %1271 = vmatmul.msk.f32.vlgmr.msrb.gmra.mxu2 %vm290_vm1, %v274_v59  ;;  %1276 = vmatmul.msk.f32.vlgmr.msrb.gmra.mxu3 %vm290_vm1, %v274_v59  ;;  %v506_v59 = vld [vmem:[%s2234_s5 + $0x150] sm:$0xff] }
 0x134   :  { %540 = vmatpush.msra.mxu2 %v467_v41  ;;  %572 = vmatpush.msra.mxu3 %v480_v48  ;;  %v434_v41 = vld [vmem:[%s2233_s4 + $0x10] sm:$0xff]  ;;  %v439_v48 = vld [vmem:[%s2233_s4 + $0x38] sm:$0xff] }
 0x136   :  { %541 = vmatpush.msra.mxu2 %v466_v43  ;;  %615 = vmatpush.msrb.mxu3 %v527_v50 }
 0x138   :  { %542 = vmatpush.msra.mxu2 %v465_v45  ;;  %616 = vmatpush.msrb.mxu3 %v526_v52 }
 0x13a   :  { %543 = vmatpush.msra.mxu2 %v464_v47  ;;  %617 = vmatpush.msrb.mxu3 %v525_v54  ;;  %v438_v47 = vld [vmem:[%s2233_s4 + $0x30] sm:$0xff]  ;;  %v443_v54 = vld [vmem:[%s2233_s4 + $0x58] sm:$0xff] }
 0x13b   :  { %1272 = vmatmul.msk.f32.gmra.mxu2 %vm290_vm1, %v275_v3  ;;  %1277 = vmatmul.msk.f32.gmra.mxu3 %vm290_vm1, %v275_v3  ;;  %v502_v3 = vld [vmem:[%s2234_s5 + $0x130] sm:$0xff] }
 0x13c   :  { %586 = vmatpush.msrb.mxu2 %v511_v49  ;;  %618 = vmatpush.msrb.mxu3 %v524_v56 }
 0x13e   :  { %587 = vmatpush.msrb.mxu2 %v510_v51  ;;  %619 = vmatpush.msrb.mxu3 %v523_v58 }
 0x140   :  { %588 = vmatpush.msrb.mxu2 %v509_v53  ;;  %620 = vmatpush.msrb.mxu3 %v522_v60  ;;  %v442_v53 = vld [vmem:[%s2233_s4 + $0x50] sm:$0xff]  ;;  %v447_v60 = vld [vmem:[%s2233_s4 + $0x78] sm:$0xff] }
 0x142   :  { %589 = vmatpush.msrb.mxu2 %v508_v55  ;;  %621 = vmatpush.msrb.mxu3 %v521_v62 }
 0x143   :  { %1273 = vmatmul.msk.f32.gmra.mxu2 %vm290_vm1, %v1741_v13  ;;  %1278 = vmatmul.msk.f32.gmra.mxu3 %vm290_vm1, %v1741_v13  ;;  %v498_v13 = vld [vmem:[%s2234_s5 + $0x110] sm:$0xff] }
 0x144   :  { %590 = vmatpush.msrb.mxu2 %v507_v57  ;;  %622 = vmatpush.msrb.mxu3 %v520_v0 }
 0x146   :  { %591 = vmatpush.msrb.mxu2 %v506_v59  ;;  %623 = vmatpush.msrb.mxu3 %v519_v2  ;;  %v446_v59 = vld [vmem:[%s2233_s4 + $0x70] sm:$0xff] }
 0x148   :  { %592 = vmatpush.msrb.mxu2 %v505_v61  ;;  %624 = vmatpush.msrb.mxu3 %v518_v4 }
 0x14a   :  { %593 = vmatpush.msrb.mxu2 %v504_v63  ;;  %625 = vmatpush.msrb.mxu3 %v517_v6 }
 0x14b   :  { %1274 = vmatmul.msk.f32.gmra.mxu2 %vm290_vm1, %v1750_v17  ;;  %1279 = vmatmul.msk.f32.gmra.mxu3 %vm290_vm1, %v1750_v17  ;;  %v513_v17 = vld [vmem:[%s2234_s5 + $0x188] sm:$0xff] }
 0x14c   :  { %594 = vmatpush.msrb.mxu2 %v503_v1  ;;  %626 = vmatpush.msrb.mxu3 %v516_v9 }
 0x14e   :  { %595 = vmatpush.msrb.mxu2 %v502_v3  ;;  %627 = vmatpush.msrb.mxu3 %v515_v12 }
 0x150   :  { %596 = vmatpush.msrb.mxu2 %v501_v5  ;;  %628 = vmatpush.msrb.mxu3 %v514_v14 }
 0x152   :  { %597 = vmatpush.msrb.mxu2 %v500_v7  ;;  %629 = vmatpush.msrb.mxu3 %v513_v17 }
 0x154   :  { %598 = vmatpush.msrb.mxu2 %v499_v10  ;;  %630 = vmatpush.msrb.mxu3 %v512_v22 }
 0x156   :  { %599 = vmatpush.msrb.mxu2 %v498_v13 }
 0x158   :  { %600 = vmatpush.msrb.mxu2 %v497_v8 }
 0x15a   :  { %601 = vmatpush.msrb.mxu2 %v496_v21 }
 0x196   :  { %v333_v18 = vpop.f32.mrf.mxu2  ;;  %v362_v19 = vpop.f32.mrf.mxu3 }
 0x197   :  { %v448_v11 = vmul.f32 %v432_v15, %v333_v18  ;;  %v449_v20 = vmul.f32 %v433_v16, %v362_v19 }
 0x199   :  { %544 = vmatmul.f32.vlgmr.msra.gmra.mxu2 %v448_v11  ;;  %573 = vmatmul.f32.vlgmr.msra.gmra.mxu3 %v449_v20 }
 0x19e   :  { %v336_v25 = vpop.f32.mrf.mxu2  ;;  %v365_v26 = vpop.f32.mrf.mxu3 }
 0x19f   :  { %v452_v27 = vmul.f32 %v436_v23, %v336_v25  ;;  %v453_v28 = vmul.f32 %v437_v24, %v365_v26 }
 0x1a1   :  { %547 = vmatmul.f32.gmra.mxu2 %v452_v27  ;;  %576 = vmatmul.f32.gmra.mxu3 %v453_v28 }
 0x1a6   :  { %v339_v31 = vpop.f32.mrf.mxu2  ;;  %v368_v32 = vpop.f32.mrf.mxu3 }
 0x1a7   :  { %v456_v33 = vmul.f32 %v440_v29, %v339_v31  ;;  %v457_v34 = vmul.f32 %v441_v30, %v368_v32  ;;  %v644_v29 = vld [vmem:[%s2235_s6] sm:$0x3]  ;;  %v2015_v30 = vld [vmem:[%s2238_s9 + $0x18] sm:$0xff]  ;;  %v2026_v32 = vld [vmem:[%s2238_s9 + $0x10] sm:$0xff]  ;;  %s1246_s6 = sshll.u32 %s2247_s18, 4  ;;  %s1247_s6 = int_to_ptr.hbm [resolvable:$true] %s1246_s6 }
 0x1a8   :  { %723 = vmatpush.msra.mxu3 %v2015_v30  ;;  %v2021_v31 = vld [vmem:[%s2237_s8 + $0x18] sm:$0xff] }
 0x1a9   :  { %550 = vmatmul.f32.gmra.mxu2 %v456_v33  ;;  %579 = vmatmul.f32.gmra.mxu3 %v457_v34  ;;  %v2033_v33 = vld [vmem:[%s2237_s8 + $0x10] sm:$0xff]  ;;  %v2038_v34 = vld [vmem:[%s2238_s9 + $0x8] sm:$0xff] }
 0x1aa   :  { %724 = vmatpush.msra.mxu3 %v2026_v32 }
 0x1ac   :  { %725 = vmatpush.msra.mxu3 %v2038_v34 }
 0x1ae   :  { %v342_v37 = vpop.f32.mrf.mxu2  ;;  %v371_v38 = vpop.f32.mrf.mxu3 }
 0x1af   :  { %v460_v39 = vmul.f32 %v444_v35, %v342_v37  ;;  %v461_v40 = vmul.f32 %v445_v36, %v371_v38  ;;  %v2045_v35 = vld [vmem:[%s2237_s8 + $0x8] sm:$0xff]  ;;  %v2050_v36 = vld [vmem:[%s2238_s9] sm:$0xff]  ;;  %v2062_v38 = vld [vmem:[%s2240_s11 + $0x18] sm:$0xff] }
 0x1b0   :  { %726 = vmatpush.msra.mxu3 %v2050_v36  ;;  %v2057_v37 = vld [vmem:[%s2237_s8] sm:$0xff]  ;;  %s1233_s8 = sshll.u32 %s1387_s3, 4  ;;  %s1234_s8 = int_to_ptr.vmem [resolvable:$true] %s1233_s8 }
 0x1b1   :  { %553 = vmatmul.f32.gmra.mxu2 %v460_v39  ;;  %582 = vmatmul.f32.gmra.mxu3 %v461_v40  ;;  %v2069_v39 = vld [vmem:[%s2240_s11 + $0x10] sm:$0xff]  ;;  %v2074_v40 = vld [vmem:[%s2240_s11 + $0x8] sm:$0xff] }
 0x1b6   :  { %v391_v43 = vpop.f32.mrf.mxu2  ;;  %v420_v44 = vpop.f32.mrf.mxu3 }
 0x1b7   :  { %v450_v45 = vmul.f32 %v434_v41, %v391_v43  ;;  %v451_v46 = vmul.f32 %v435_v42, %v420_v44  ;;  %v2080_v41 = vld [vmem:[%s2240_s11] sm:$0xff] }
 0x1b8   :  { %v1303_v42 = vld [vmem:[%s2236_s7] ss:$0 sm:$0xff] }
 0x1b9   :  { %602 = vmatmul.f32.vlgmr.msrb.gmra.mxu2 %v450_v45  ;;  %631 = vmatmul.f32.vlgmr.msrb.gmra.mxu3 %v451_v46 }
 0x1ba   :  { %783 = vmatpush.msrb.mxu3 %v2062_v38 }
 0x1bc   :  { %784 = vmatpush.msrb.mxu3 %v2069_v39 }
 0x1be   :  { %v394_v49 = vpop.f32.mrf.mxu2  ;;  %v423_v50 = vpop.f32.mrf.mxu3  ;;  %785 = vmatpush.msrb.mxu3 %v2074_v40 }
 0x1bf   :  { %v454_v51 = vmul.f32 %v438_v47, %v394_v49  ;;  %v455_v52 = vmul.f32 %v439_v48, %v423_v50  ;;  %v2101_v47 = vld [vmem:[%s2239_s10] ss:$0 sm:$0xff] }
 0x1c0   :  { %786 = vmatpush.msrb.mxu3 %v2080_v41 }
 0x1c1   :  { %605 = vmatmul.f32.gmra.mxu2 %v454_v51  ;;  %634 = vmatmul.f32.gmra.mxu3 %v455_v52 }
 0x1c6   :  { %v397_v55 = vpop.f32.mrf.mxu2  ;;  %v426_v56 = vpop.f32.mrf.mxu3 }
 0x1c7   :  { %v458_v57 = vmul.f32 %v442_v53, %v397_v55  ;;  %v459_v58 = vmul.f32 %v443_v54, %v426_v56  ;;  %v2108_v53 = vld [vmem:[%s2242_s13] sm:$0xf]  ;;  %v706_v54 = vld [vmem:[%s2243_s14 + $0x78] sm:$0xff]  ;;  %v705_v55 = vld [vmem:[%s2243_s14 + $0x70] sm:$0xff] }
 0x1c8   :  { %838 = vmatpush.msrb.mxu1 %v706_v54  ;;  %1148 = vmatpush.msrb.mxu0 %v706_v54  ;;  %v704_v56 = vld [vmem:[%s2243_s14 + $0x68] sm:$0xff] }
 0x1c9   :  { %608 = vmatmul.f32.gmra.mxu2 %v458_v57  ;;  %637 = vmatmul.f32.gmra.mxu3 %v459_v58  ;;  %v703_v57 = vld [vmem:[%s2243_s14 + $0x60] sm:$0xff]  ;;  %v702_v58 = vld [vmem:[%s2243_s14 + $0x58] sm:$0xff] }
 0x1ca   :  { %839 = vmatpush.msrb.mxu1 %v705_v55  ;;  %1149 = vmatpush.msrb.mxu0 %v705_v55 }
 0x1cc   :  { %840 = vmatpush.msrb.mxu1 %v704_v56  ;;  %1150 = vmatpush.msrb.mxu0 %v704_v56 }
 0x1ce   :  { %v400_v61 = vpop.f32.mrf.mxu2  ;;  %v429_v62 = vpop.f32.mrf.mxu3  ;;  %841 = vmatpush.msrb.mxu1 %v703_v57  ;;  %1151 = vmatpush.msrb.mxu0 %v703_v57 }
 0x1cf   :  { %v462_v63 = vmul.f32 %v446_v59, %v400_v61  ;;  %v463_v0 = vmul.f32 %v447_v60, %v429_v62  ;;  %v701_v59 = vld [vmem:[%s2243_s14 + $0x50] sm:$0xff]  ;;  %v700_v60 = vld [vmem:[%s2243_s14 + $0x48] sm:$0xff]  ;;  %v699_v61 = vld [vmem:[%s2243_s14 + $0x40] sm:$0xff] }
 0x1d0   :  { %842 = vmatpush.msrb.mxu1 %v702_v58  ;;  %1152 = vmatpush.msrb.mxu0 %v702_v58  ;;  %v698_v62 = vld [vmem:[%s2243_s14 + $0x38] sm:$0xff] }
 0x1d1   :  { %611 = vmatmul.f32.gmra.mxu2 %v462_v63  ;;  %640 = vmatmul.f32.gmra.mxu3 %v463_v0  ;;  %v697_v63 = vld [vmem:[%s2243_s14 + $0x30] sm:$0xff]  ;;  %v696_v0 = vld [vmem:[%s2243_s14 + $0x28] sm:$0xff] }
 0x1d2   :  { %843 = vmatpush.msrb.mxu1 %v701_v59  ;;  %1153 = vmatpush.msrb.mxu0 %v701_v59 }
 0x1d4   :  { %844 = vmatpush.msrb.mxu1 %v700_v60  ;;  %1154 = vmatpush.msrb.mxu0 %v700_v60 }
 0x1d6   :  { %845 = vmatpush.msrb.mxu1 %v699_v61  ;;  %1155 = vmatpush.msrb.mxu0 %v699_v61 }
 0x1d8   :  { %846 = vmatpush.msrb.mxu1 %v698_v62  ;;  %1156 = vmatpush.msrb.mxu0 %v698_v62 }
 0x1da   :  { %847 = vmatpush.msrb.mxu1 %v697_v63  ;;  %1157 = vmatpush.msrb.mxu0 %v697_v63 }
 0x1dc   :  { %848 = vmatpush.msrb.mxu1 %v696_v0  ;;  %1158 = vmatpush.msrb.mxu0 %v696_v0 }
 0x21c   :  { %v545_v1 = vpop.f32.mrf.mxu2  ;;  %v574_v2 = vpop.f32.mrf.mxu3 }
 0x21d   :  { %v575_v22 = vadd.f32 %v574_v2, %v545_v1 }
 0x224   :  { %v548_v3 = vpop.f32.mrf.mxu2  ;;  %v577_v4 = vpop.f32.mrf.mxu3 }
 0x225   :  { %v578_v19 = vadd.f32 %v577_v4, %v548_v3 }
 0x22c   :  { %v551_v5 = vpop.f32.mrf.mxu2  ;;  %v580_v6 = vpop.f32.mrf.mxu3 }
 0x22d   :  { %v581_v8 = vadd.f32 %v580_v6, %v551_v5  ;;  %v2154_v6 = vld [vmem:[%s2241_s12] ss:$0 sm:$0xff] }
 0x234   :  { %v554_v7 = vpop.f32.mrf.mxu2  ;;  %v583_v9 = vpop.f32.mrf.mxu3 }
 0x235   :  { %v584_v17 = vadd.f32 %v583_v9, %v554_v7 }
 0x23c   :  { %v603_v10 = vpop.f32.mrf.mxu2  ;;  %v632_v12 = vpop.f32.mrf.mxu3 }
 0x23d   :  { %v604_v25 = vadd.f32 %v603_v10, %v575_v22 }
 0x23f   :  { %v633_v28 = vadd.f32 %v632_v12, %v604_v25  ;;  %v695_v12 = vld [vmem:[%s2243_s14 + $0x20] sm:$0xff] }
 0x240   :  { %849 = vmatpush.msrb.mxu1 %v695_v12  ;;  %1159 = vmatpush.msrb.mxu0 %v695_v12 }
 0x244   :  { %v606_v13 = vpop.f32.mrf.mxu2  ;;  %v635_v14 = vpop.f32.mrf.mxu3 }
 0x245   :  { %v607_v23 = vadd.f32 %v606_v13, %v578_v19  ;;  %v694_v13 = vld [vmem:[%s2243_s14 + $0x18] sm:$0xff] }
 0x246   :  { %850 = vmatpush.msrb.mxu1 %v694_v13  ;;  %1160 = vmatpush.msrb.mxu0 %v694_v13 }
 0x247   :  { %v636_v27 = vadd.f32 %v635_v14, %v607_v23  ;;  %v693_v14 = vld [vmem:[%s2243_s14 + $0x10] sm:$0xff] }
 0x248   :  { %851 = vmatpush.msrb.mxu1 %v693_v14  ;;  %1161 = vmatpush.msrb.mxu0 %v693_v14 }
 0x24c   :  { %v609_v15 = vpop.f32.mrf.mxu2  ;;  %v638_v16 = vpop.f32.mrf.mxu3 }
 0x24d   :  { %v610_v11 = vadd.f32 %v609_v15, %v581_v8 }
 0x24f   :  { %v639_v26 = vadd.f32 %v638_v16, %v610_v11  ;;  %v692_v16 = vld [vmem:[%s2243_s14 + $0x8] sm:$0xff] }
 0x250   :  { %852 = vmatpush.msrb.mxu1 %v692_v16  ;;  %1162 = vmatpush.msrb.mxu0 %v692_v16 }
 0x254   :  { %v612_v18 = vpop.f32.mrf.mxu2  ;;  %v641_v21 = vpop.f32.mrf.mxu3 }
 0x255   :  { %v613_v20 = vadd.f32 %v612_v18, %v584_v17  ;;  %v691_v17 = vld [vmem:[%s2243_s14] sm:$0xff] }
 0x256   :  { %853 = vmatpush.msrb.mxu1 %v691_v17  ;;  %1163 = vmatpush.msrb.mxu0 %v691_v17 }
 0x257   :  { %v642_v24 = vadd.f32 %v641_v21, %v613_v20 }
 0x258   :  { %1291 = vmatpush.msk.msra.mxu1 %vm303_vm0, %v2108_v53 }
 0x259   :  { %665 = vmatpush.msra.mxu2 %v642_v24 }
 0x25b   :  { %666 = vmatpush.msra.mxu2 %v639_v26 }
 0x25d   :  { %667 = vmatpush.msra.mxu2 %v636_v27 }
 0x25f   :  { %668 = vmatpush.msra.mxu2 %v633_v28 }
 0x260   :  { %1280 = vmatmul.msk.f32.vlgmr.msra.gmra.mxu2 %vm649_vm2, %v644_v29 }
 0x261   :  { %746 = vmatpush.msrb.mxu2 %v2021_v31 }
 0x263   :  { %747 = vmatpush.msrb.mxu2 %v2033_v33 }
 0x265   :  { %748 = vmatpush.msrb.mxu2 %v2045_v35 }
 0x267   :  { %749 = vmatpush.msrb.mxu2 %v2057_v37 }
 0x269   :  { %1285 = vmatpush.msk.msra.mxu2 %vm303_vm0, %v2108_v53 }
 0x2e3   :  { %v670_v43 = vpop.f32.mrf.mxu2 }
 0x2e4   :  { %v671_v44 = vadd.f32 %v1303_v42, %v670_v43 }
 0x2e6   :  { %v673_v45 = vmax.f32 %v671_v44, 0.0 }
 0x2e8   :  { %v707_v46 = vmul.f32 %v673_v45, %v673_v45  ;;  %1281 = vmatmul.msk.f32.vlgmr.msra.gmra.mxu3 %vm649_vm2, %v673_v45  ;;  %675 = vst.msk [vmem:[#allocation2] sm:$0x3] %vm674_vm3, %v673_v45 }
 0x2e9   :  { %889 = vmatpush.msra.mxu3 %v2015_v30  ;;  %1238 = dma.vmem_to_hbm [thread:$0]  %s1234_s8, 32, %s1236_s29, [#allocation3]  }
 0x2ea   :  { %1282 = vmatmul.msk.f32.vlgmr.msrb.gmra.mxu2 %vm649_vm2, %v707_v46 }
 0x2eb   :  { %890 = vmatpush.msra.mxu3 %v2026_v32  ;;  %912 = vmatpush.msrb.mxu2 %v2021_v31 }
 0x2ed   :  { %891 = vmatpush.msra.mxu3 %v2038_v34  ;;  %913 = vmatpush.msrb.mxu2 %v2033_v33 }
 0x2ef   :  { %892 = vmatpush.msra.mxu3 %v2050_v36  ;;  %914 = vmatpush.msrb.mxu2 %v2045_v35 }
 0x2f0   :  { %1283 = vmatmul.msk.f32.vlgmr.msrb.gmra.mxu3 %vm649_vm2, %v673_v45 }
 0x2f1   :  { %942 = vmatpush.msrb.mxu3 %v2062_v38  ;;  %915 = vmatpush.msrb.mxu2 %v2057_v37 }
 0x2f3   :  { %943 = vmatpush.msrb.mxu3 %v2069_v39 }
 0x2f5   :  { %944 = vmatpush.msrb.mxu3 %v2074_v40 }
 0x2f7   :  { %945 = vmatpush.msrb.mxu3 %v2080_v41 }
 0x36b   :  { %v728_v48 = vpop.f32.mrf.mxu3 }
 0x36d   :  { %v751_v49 = vpop.f32.mrf.mxu2 }
 0x36e   :  { %v752_v50 = vadd.f32 %v751_v49, %v728_v48 }
 0x370   :  { %v757_v51 = vadd.f32 %v2101_v47, %v752_v50 }
 0x372   :  { %v759_v52 = vsel %vm758_vm4, %v757_v51, -inf }
 0x373   :  { %760 = vmax.xlane.f32.xlu0 %v759_v52  ;;  %v788_v7 = vpop.f32.mrf.mxu3 }
 0x374   :  { %v789_v9 = vadd.f32 %v2154_v6, %v788_v7 }
 0x376   :  { %v1284_v10 = vmul.f32 -1.442695, %v789_v9 }
 0x3e6   :  { %v761_v1 = vpop.xlane.xlu0 %760 }
 0x3e7   :  { %v762_v2 = vsub.f32 %v757_v51, %v761_v1 }
 0x3e9   :  { %v763_v3 = vmul.f32 1.442695, %v762_v2 }
 0x3eb   :  { %1307 = vpow2.f32 %v763_v3 }
 0x3ec   :  { %1309 = vpow2.f32 %v1284_v10 }
 0x3f1   :  { %v1308_v4 = vpop.eup %1307 }
 0x3f2   :  { %1286 = vmatmul.msk.f32.vlgmr.msra.gmra.mxu2 %vm810_vm5, %v1308_v4  ;;  %v765_v5 = vsel %vm758_vm4, %v1308_v4, 0.0  ;;  %v1310_v15 = vpop.eup %1309 }
 0x3f3   :  { %766 = vadd.xlane.f32.xlu0 %v765_v5  ;;  %993 = vmatpush.msra.mxu2 %v706_v54  ;;  %v794_v8 = vadd.f32 1.0, %v1310_v15 }
 0x3f5   :  { %994 = vmatpush.msra.mxu2 %v705_v55  ;;  %1311 = vrcp.f32 %v794_v8  ;;  %v806_v22 = vand.u32 2147483648, %v794_v8  ;;  %vm800_vm7 = vweird.f32 %v794_v8  ;;  %v804_v23 = vand.u32 2147483647, %v794_v8 }
 0x3f7   :  { %995 = vmatpush.msra.mxu2 %v704_v56  ;;  %v807_v25 = vor.u32 1.1754944e-38, %v806_v22  ;;  %vm805_vm9 = vcmp.eq.f32.partialorder %v804_v23, 8.507059e+37 }
 0x3f9   :  { %996 = vmatpush.msra.mxu2 %v703_v57 }
 0x3fb   :  { %997 = vmatpush.msra.mxu2 %v702_v58  ;;  %v1312_v18 = vpop.eup %1311 }
 0x3fc   :  { %v796_v19 = vmul.f32 %v1312_v18, %v794_v8  ;;  %vm801_vm6 = vweird.f32 %v1312_v18 }
 0x3fd   :  { %998 = vmatpush.msra.mxu2 %v701_v59  ;;  %vm802_vm8 = vmor %vm800_vm7, %vm801_vm6 }
 0x3fe   :  { %v797_v11 = vsub.f32 1.0, %v796_v19 }
 0x3ff   :  { %999 = vmatpush.msra.mxu2 %v700_v60 }
 0x400   :  { %v798_v20 = vmul.f32 %v1312_v18, %v797_v11 }
 0x401   :  { %1000 = vmatpush.msra.mxu2 %v699_v61 }
 0x402   :  { %v799_v21 = vadd.f32 %v1312_v18, %v798_v20 }
 0x403   :  { %1001 = vmatpush.msra.mxu2 %v698_v62 }
 0x404   :  { %v803_v24 = vsel %vm802_vm8, %v1312_v18, %v799_v21 }
 0x405   :  { %1002 = vmatpush.msra.mxu2 %v697_v63  ;;  %v808_v26 = vsel %vm805_vm9, %v807_v25, %v803_v24 }
 0x407   :  { %1003 = vmatpush.msra.mxu2 %v696_v0 }
 0x409   :  { %1004 = vmatpush.msra.mxu2 %v695_v12 }
 0x40b   :  { %1005 = vmatpush.msra.mxu2 %v694_v13 }
 0x40d   :  { %1006 = vmatpush.msra.mxu2 %v693_v14 }
 0x40f   :  { %1007 = vmatpush.msra.mxu2 %v692_v16 }
 0x411   :  { %1008 = vmatpush.msra.mxu2 %v691_v17 }
 0x466   :  { %v767_v29 = vpop.xlane.xlu0 %766 }
 0x467   :  { %1313 = vrcp.f32 %v767_v29  ;;  %v869_v48 = vand.u32 2147483648, %v767_v29  ;;  %vm863_vm11 = vweird.f32 %v767_v29  ;;  %v867_v49 = vand.u32 2147483647, %v767_v29 }
 0x469   :  { %vm868_vm13 = vcmp.eq.f32.partialorder %v867_v49, 8.507059e+37  ;;  %v1186_v49 = vld [vmem:[%s2244_s15 + $0x18] sm:$0xff] }
 0x46d   :  { %v1314_v42 = vpop.eup %1313 }
 0x46e   :  { %v859_v43 = vmul.f32 %v1314_v42, %v767_v29  ;;  %vm864_vm10 = vweird.f32 %v1314_v42 }
 0x46f   :  { %vm865_vm12 = vmor %vm863_vm11, %vm864_vm10 }
 0x470   :  { %v860_v44 = vsub.f32 1.0, %v859_v43 }
 0x472   :  { %v861_v45 = vmul.f32 %v1314_v42, %v860_v44 }
 0x474   :  { %v862_v46 = vadd.f32 %v1314_v42, %v861_v45 }
 0x475   :  { %v834_v27 = vpop.f32.mrf.mxu2 }
 0x476   :  { %v837_v28 = vmul.f32 %v834_v27, %v808_v26  ;;  %v866_v50 = vsel %vm865_vm12, %v1314_v42, %v862_v46 }
 0x478   :  { %854 = vmatmul.f32.vlgmr.msrb.gmra.mxu1 %v837_v28 }
 0x479   :  { %1097 = vmatpush.msrb.mxu1 %v2062_v38  ;;  %v870_v38 = vor.u32 1.1754944e-38, %v869_v48 }
 0x47b   :  { %1098 = vmatpush.msrb.mxu1 %v2069_v39  ;;  %v871_v51 = vsel %vm868_vm13, %v870_v38, %v866_v50  ;;  %v1185_v50 = vld [vmem:[%s2244_s15 + $0x10] sm:$0xff] }
 0x47d   :  { %1099 = vmatpush.msrb.mxu1 %v2074_v40 }
 0x47f   :  { %1100 = vmatpush.msrb.mxu1 %v2080_v41 }
 0x4f5   :  { %v855_v39 = vpop.f32.mrf.mxu1 }
 0x4f6   :  { %v872_v40 = vmul.f32 %v871_v51, %v855_v39 }
 0x4f8   :  { %v873_v52 = vmul.f32 %v872_v40, %v872_v40  ;;  %1287 = vmatmul.msk.f32.vlgmr.msra.gmra.mxu3 %vm649_vm2, %v872_v40 }
 0x4f9   :  { %1044 = vmatpush.msra.mxu3 %v2015_v30 }
 0x4fa   :  { %1288 = vmatmul.msk.f32.vlgmr.msrb.gmra.mxu2 %vm649_vm2, %v873_v52 }
 0x4fb   :  { %1045 = vmatpush.msra.mxu3 %v2026_v32 }
 0x4fd   :  { %1046 = vmatpush.msra.mxu3 %v2038_v34 }
 0x4ff   :  { %1047 = vmatpush.msra.mxu3 %v2050_v36 }
 0x500   :  { %1289 = vmatmul.msk.f32.vlgmr.msrb.gmra.mxu3 %vm649_vm2, %v872_v40 }
 0x501   :  { %1067 = vmatpush.msrb.mxu3 %v2021_v31 }
 0x503   :  { %1068 = vmatpush.msrb.mxu3 %v2033_v33 }
 0x505   :  { %1069 = vmatpush.msrb.mxu3 %v2045_v35 }
 0x507   :  { %1070 = vmatpush.msrb.mxu3 %v2057_v37 }
 0x57b   :  { %v894_v41 = vpop.f32.mrf.mxu3 }
 0x57d   :  { %v917_v30 = vpop.f32.mrf.mxu2 }
 0x57e   :  { %v918_v54 = vadd.f32 %v917_v30, %v894_v41 }
 0x580   :  { %v920_v55 = vadd.f32 %v2101_v47, %v918_v54 }
 0x582   :  { %v921_v32 = vsel %vm758_vm4, %v920_v55, -inf }
 0x583   :  { %922 = vmax.xlane.f32.xlu1 %v921_v32  ;;  %v947_v33 = vpop.f32.mrf.mxu3 }
 0x584   :  { %v948_v35 = vadd.f32 %v2154_v6, %v947_v33 }
 0x586   :  { %v1290_v37 = vmul.f32 -1.442695, %v948_v35 }
 0x5f6   :  { %v923_v34 = vpop.xlane.xlu1 %922 }
 0x5f7   :  { %v924_v36 = vsub.f32 %v920_v55, %v923_v34 }
 0x5f9   :  { %v925_v56 = vmul.f32 1.442695, %v924_v36  ;;  %v1184_v36 = vld [vmem:[%s2244_s15 + $0x8] sm:$0xff] }
 0x5fb   :  { %1315 = vpow2.f32 %v925_v56 }
 0x5fc   :  { %1317 = vpow2.f32 %v1290_v37 }
 0x601   :  { %v1316_v57 = vpop.eup %1315 }
 0x602   :  { %1292 = vmatmul.msk.f32.vlgmr.msra.gmra.mxu1 %vm810_vm5, %v1316_v57  ;;  %v927_v31 = vsel %vm758_vm4, %v1316_v57, 0.0  ;;  %v1318_v58 = vpop.eup %1317  ;;  %v1183_v57 = vld [vmem:[%s2244_s15] sm:$0xff] }
 0x603   :  { %928 = vadd.xlane.f32.xlu1 %v927_v31  ;;  %v953_v59 = vadd.f32 1.0, %v1318_v58  ;;  %1206 = vmatpush.msra.mxu1 %v1186_v49 }
 0x605   :  { %1319 = vrcp.f32 %v953_v59  ;;  %v965_v1 = vand.u32 2147483648, %v953_v59  ;;  %vm959_vm15 = vweird.f32 %v953_v59  ;;  %v963_v2 = vand.u32 2147483647, %v953_v59  ;;  %1207 = vmatpush.msra.mxu1 %v1185_v50 }
 0x607   :  { %v966_v4 = vor.u32 1.1754944e-38, %v965_v1  ;;  %vm964_vm3 = vcmp.eq.f32.partialorder %v963_v2, 8.507059e+37  ;;  %1208 = vmatpush.msra.mxu1 %v1184_v36  ;;  %v1306_v2 = vld [vmem:[%s2245_s16] ss:$0 sm:$0xff]  ;;  %s1388_s16 = smov [#allocation4]  }
 0x608   :  { %s1244_s7 = sshll.u32 %s1388_s16, 4  ;;  %s1245_s7 = int_to_ptr.vmem [resolvable:$true] %s1244_s7 }
 0x609   :  { %1209 = vmatpush.msra.mxu1 %v1183_v57 }
 0x60b   :  { %v1320_v60 = vpop.eup %1319 }
 0x60c   :  { %v955_v61 = vmul.f32 %v1320_v60, %v953_v59  ;;  %vm960_vm14 = vweird.f32 %v1320_v60 }
 0x60d   :  { %vm961_vm1 = vmor %vm959_vm15, %vm960_vm14  ;;  %vm1214_vm15 = vcmask 74752  }
 0x60e   :  { %v956_v62 = vsub.f32 1.0, %v955_v61 }
 0x610   :  { %v957_v63 = vmul.f32 %v1320_v60, %v956_v62 }
 0x612   :  { %v958_v0 = vadd.f32 %v1320_v60, %v957_v63 }
 0x614   :  { %v962_v3 = vsel %vm961_vm1, %v1320_v60, %v958_v0 }
 0x615   :  { %v967_v5 = vsel %vm964_vm3, %v966_v4, %v962_v3 }
 0x676   :  { %v929_v10 = vpop.xlane.xlu1 %928 }
 0x677   :  { %1321 = vrcp.f32 %v929_v10  ;;  %v1024_v8 = vand.u32 2147483648, %v929_v10  ;;  %vm1018_vm7 = vweird.f32 %v929_v10  ;;  %v1022_v17 = vand.u32 2147483647, %v929_v10 }
 0x679   :  { %v1025_v19 = vor.u32 1.1754944e-38, %v1024_v8  ;;  %vm1023_vm9 = vcmp.eq.f32.partialorder %v1022_v17, 8.507059e+37 }
 0x67d   :  { %v1322_v12 = vpop.eup %1321 }
 0x67e   :  { %v1014_v13 = vmul.f32 %v1322_v12, %v929_v10  ;;  %vm1019_vm6 = vweird.f32 %v1322_v12 }
 0x67f   :  { %v989_v7 = vpop.f32.mrf.mxu1  ;;  %vm1020_vm8 = vmor %vm1018_vm7, %vm1019_vm6 }
 0x680   :  { %v992_v9 = vmul.f32 %v989_v7, %v967_v5  ;;  %v1015_v14 = vsub.f32 1.0, %v1014_v13 }
 0x682   :  { %1009 = vmatmul.f32.vlgmr.msra.gmra.mxu2 %v992_v9  ;;  %v1016_v15 = vmul.f32 %v1322_v12, %v1015_v14 }
 0x684   :  { %v1017_v16 = vadd.f32 %v1322_v12, %v1016_v15 }
 0x686   :  { %v1021_v18 = vsel %vm1020_vm8, %v1322_v12, %v1017_v16 }
 0x687   :  { %v1026_v20 = vsel %vm1023_vm9, %v1025_v19, %v1021_v18 }
 0x705   :  { %v1010_v11 = vpop.f32.mrf.mxu2 }
 0x706   :  { %v1027_v21 = vmul.f32 %v1026_v20, %v1010_v11 }
 0x708   :  { %1293 = vmatmul.msk.f32.vlgmr.msra.gmra.mxu3 %vm649_vm2, %v1027_v21  ;;  %1295 = vmatmul.msk.f32.vlgmr.msrb.gmra.mxu1 %vm649_vm2, %v1027_v21  ;;  %v1028_v22 = vmul.f32 %v1027_v21, %v1027_v21 }
 0x709   :  { %1297 = vmatpush.msk.msra.mxu3 %vm303_vm0, %v2108_v53 }
 0x710   :  { %1294 = vmatmul.msk.f32.vlgmr.msrb.gmra.mxu3 %vm649_vm2, %v1028_v22 }
 0x785   :  { %v1102_v44 = vpop.f32.mrf.mxu1 }
 0x786   :  { %v1103_v45 = vadd.f32 %v2154_v6, %v1102_v44 }
 0x788   :  { %v1296_v46 = vmul.f32 -1.442695, %v1103_v45 }
 0x78b   :  { %v1049_v23 = vpop.f32.mrf.mxu3 }
 0x793   :  { %v1072_v24 = vpop.f32.mrf.mxu3 }
 0x794   :  { %v1073_v25 = vadd.f32 %v1072_v24, %v1049_v23 }
 0x796   :  { %v1075_v26 = vadd.f32 %v2101_v47, %v1073_v25 }
 0x798   :  { %v1076_v27 = vsel %vm758_vm4, %v1075_v26, -inf }
 0x799   :  { %1077 = vmax.xlane.f32.xlu2 %v1076_v27 }
 0x80c   :  { %v1078_v28 = vpop.xlane.xlu2 %1077 }
 0x80d   :  { %v1079_v29 = vsub.f32 %v1075_v26, %v1078_v28 }
 0x80f   :  { %v1080_v42 = vmul.f32 1.442695, %v1079_v29 }
 0x811   :  { %1323 = vpow2.f32 %v1080_v42 }
 0x812   :  { %1325 = vpow2.f32 %v1296_v46 }
 0x817   :  { %v1324_v43 = vpop.eup %1323 }
 0x818   :  { %1298 = vmatmul.msk.f32.vlgmr.msra.gmra.mxu3 %vm810_vm5, %v1324_v43  ;;  %v1082_v53 = vsel %vm758_vm4, %v1324_v43, 0.0  ;;  %v1326_v48 = vpop.eup %1325 }
 0x819   :  { %1083 = vadd.xlane.f32.xlu2 %v1082_v53  ;;  %v1108_v47 = vadd.f32 1.0, %v1326_v48 }
 0x81b   :  { %1327 = vrcp.f32 %v1108_v47  ;;  %v1120_v52 = vand.u32 2147483648, %v1108_v47  ;;  %vm1114_vm4 = vweird.f32 %v1108_v47  ;;  %v1118_v41 = vand.u32 2147483647, %v1108_v47 }
 0x81d   :  { %v1121_v54 = vor.u32 1.1754944e-38, %v1120_v52  ;;  %vm1119_vm10 = vcmp.eq.f32.partialorder %v1118_v41, 8.507059e+37 }
 0x821   :  { %v1328_v38 = vpop.eup %1327 }
 0x822   :  { %v1110_v39 = vmul.f32 %v1328_v38, %v1108_v47  ;;  %vm1115_vm0 = vweird.f32 %v1328_v38 }
 0x823   :  { %vm1116_vm5 = vmor %vm1114_vm4, %vm1115_vm0 }
 0x824   :  { %v1111_v51 = vsub.f32 1.0, %v1110_v39 }
 0x826   :  { %v1112_v40 = vmul.f32 %v1328_v38, %v1111_v51 }
 0x828   :  { %v1113_v6 = vadd.f32 %v1328_v38, %v1112_v40 }
 0x82a   :  { %v1117_v30 = vsel %vm1116_vm5, %v1328_v38, %v1113_v6 }
 0x82b   :  { %v1122_v55 = vsel %vm1119_vm10, %v1121_v54, %v1117_v30 }
 0x88c   :  { %v1084_v56 = vpop.xlane.xlu2 %1083 }
 0x88d   :  { %1329 = vrcp.f32 %v1084_v56  ;;  %v1179_v59 = vand.u32 2147483648, %v1084_v56  ;;  %vm1173_vm12 = vweird.f32 %v1084_v56  ;;  %v1177_v60 = vand.u32 2147483647, %v1084_v56 }
 0x88f   :  { %v1180_v62 = vor.u32 1.1754944e-38, %v1179_v59  ;;  %vm1178_vm14 = vcmp.eq.f32.partialorder %v1177_v60, 8.507059e+37 }
 0x893   :  { %v1330_v31 = vpop.eup %1329 }
 0x894   :  { %v1169_v33 = vmul.f32 %v1330_v31, %v1084_v56  ;;  %vm1174_vm11 = vweird.f32 %v1330_v31 }
 0x895   :  { %vm1175_vm13 = vmor %vm1173_vm12, %vm1174_vm11 }
 0x896   :  { %v1170_v35 = vsub.f32 1.0, %v1169_v33 }
 0x898   :  { %v1171_v37 = vmul.f32 %v1330_v31, %v1170_v35 }
 0x89a   :  { %v1172_v58 = vadd.f32 %v1330_v31, %v1171_v37 }
 0x89b   :  { %v1144_v32 = vpop.f32.mrf.mxu3 }
 0x89c   :  { %v1147_v34 = vmul.f32 %v1144_v32, %v1122_v55  ;;  %v1176_v61 = vsel %vm1175_vm13, %v1330_v31, %v1172_v58 }
 0x89d   :  { %v1181_v0 = vsel %vm1178_vm14, %v1180_v62, %v1176_v61 }
 0x89e   :  { %1164 = vmatmul.f32.vlgmr.msrb.gmra.mxu0 %v1147_v34 }
 0x91b   :  { %v1165_v63 = vpop.f32.mrf.mxu0 }
 0x91c   :  { %v1182_v1 = vmul.f32 %v1181_v0, %v1165_v63 }
 0x91e   :  { %1299 = vmatmul.msk.f32.vlgmr.msra.gmra.mxu1 %vm649_vm2, %v1182_v1 }
 0x99b   :  { %v1211_v3 = vpop.f32.mrf.mxu1 }
 0x99c   :  { %v1212_v4 = vadd.f32 %v1306_v2, %v1211_v3 }
 0x99e   :  { %v1215_v5 = vsel %vm1214_vm15, %v1212_v4, -inf }
 0x99f   :  { %1216 = vmax.xlane.f32.xlu0 %v1215_v5 }
 0xa12   :  { %v1217_v7 = vpop.xlane.xlu0 %1216 }
 0xa13   :  { %v1218_v9 = vsub.f32 %v1212_v4, %v1217_v7 }
 0xa15   :  { %v1219_v10 = vmul.f32 1.442695, %v1218_v9 }
 0xa17   :  { %1331 = vpow2.f32 %v1219_v10 }
 0xa1d   :  { %v1332_v12 = vpop.eup %1331 }
 0xa1e   :  { %v1221_v13 = vsel %vm1214_vm15, %v1332_v12, 0.0 }
 0xa1f   :  { %1222 = vadd.xlane.f32.xlu1 %v1221_v13 }
 0xa92   :  { %v1223_v14 = vpop.xlane.xlu1 %1222 }
 0xa93   :  { %1333 = vlog2.f32 %v1223_v14 }
 0xa99   :  { %v1334_v15 = vpop.eup %1333 }
 0xa9a   :  { %v1225_v16 = vmul.f32 0.6931472, %v1334_v15 }
 0xa9c   :  { %v1226_v8 = vsub.f32 %v1218_v9, %v1225_v16 }
 0xa9e   :  { %1227 = vst.msk [vmem:[#allocation4] sm:$0x3] %vm1214_vm15, %v1226_v8 }
 0xa9f   :  { %1249 = dma.vmem_to_hbm [thread:$0]  %s1245_s7, 32, %s1247_s6, [#allocation5]  }
 0xaa0   :  { %1383 = dma.done.wait [#allocation3], 32  }
 0xaa1   :  { %1384 = vsyncadd [#allocation3], 4294967264 }
 0xaa2   :  { %1385 = dma.done.wait [#allocation5], 32  }
 0xaa3   :  { %1386 = vsyncadd [#allocation5], 4294967264 }
 0xaa4   :  { %1258 = vsyncpa [#allocation3], 1 }
 0xaa5   :  { %1259 = vsyncpa [#allocation5], 1 }

</bundles_post_ra>
